<compile_context>
chip_gen: v7x
topology: tpu7x:2x2x1
jax: 0.10.0
libtpu: 0.0.40
codegen_flags: <defaults>
</compile_context>

<pallas_src>
import functools

import jax
import jax.numpy as jnp
from jax import lax
from jax.experimental import pallas as pl
from jax.experimental.pallas import tpu as pltpu


def _round_up(x, m):
    return ((x + m - 1) // m) * m


def _conv_bn_prelu_kernel(x_ref, w_ref, p_ref, o_ref, acc_ref, *, offs, n_rows):
    # x_ref:   (1, L, Cin_p)          flattened zero-padded NHWC rows (bf16)
    # w_ref:   (kH*kW, Cin_p, Cout_p) per-tap conv weights, BN scale folded (bf16)
    # p_ref:   (8, Cout_p)            row 0 = BN shift, row 1 = PReLU alpha (f32)
    # o_ref:   (1, n_rows, Cout_p)    outputs over the padded width (f32)
    # acc_ref: (n_rows, Cout_p)       f32 VMEM accumulator
    for t, off in enumerate(offs):          # static unroll over the kH*kW taps
        patch = x_ref[0, off:off + n_rows, :]               # static row window
        contrib = jnp.dot(patch, w_ref[t],
                          preferred_element_type=jnp.float32)
        if t == 0:
            acc_ref[...] = contrib
        else:
            acc_ref[...] += contrib

    y = acc_ref[...] + p_ref[0:1, :]                        # fused BN shift
    alpha = p_ref[1:2, :]
    y = jnp.where(y >= 0.0, y, alpha * y)                   # per-channel PReLU
    o_ref[0] = y.astype(o_ref.dtype)


def conv_batchnorm_prelu(x_nchw, weight_oihw, gamma, beta, running_mean,
                         running_var, prelu_alpha, *, eps=1e-5,
                         compute_dtype=jnp.bfloat16):
    """ConvBatchnormRelu forward (stride=1, groups=1, eval-mode BN, dropout=0)."""
    N, Cin, H, W = x_nchw.shape
    Cout, Cin_w, kH, kW = weight_oihw.shape
    assert Cin_w == Cin, "groups != 1 not supported"  # TODO(synk): grouped conv
    pad = (kH - 1) // 2

    Wp = _round_up(W + 2 * pad, 8)          # padded width, sublane aligned
    Hp = H + 2 * pad
    Cin_p = _round_up(Cin, 8)
    Cout_p = _round_up(Cout, 128)           # lane-dense output channels
    n_rows = H * Wp                         # output rows computed per image
    extra = 8                               # slack rows for the last taps
    L = Hp * Wp + extra

    # --- fold eval-mode BatchNorm into the conv weights + a per-channel shift ---
    inv_std = 1.0 / jnp.sqrt(running_var.astype(jnp.float32) + eps)
    scale = gamma.astype(jnp.float32) * inv_std
    shift = beta.astype(jnp.float32) - running_mean.astype(jnp.float32) * scale
    # PReLU slope: supports per-channel (Cout,) or PyTorch's single shared param.
    alpha = jnp.broadcast_to(
        jnp.asarray(prelu_alpha, jnp.float32).reshape(-1), (Cout,))

    w = weight_oihw.astype(jnp.float32) * scale[:, None, None, None]
    w_taps = jnp.transpose(w, (2, 3, 1, 0)).reshape(kH * kW, Cin, Cout)
    w_taps = jnp.pad(w_taps, ((0, 0), (0, Cin_p - Cin), (0, Cout_p - Cout)))
    w_taps = w_taps.astype(compute_dtype)

    params = jnp.zeros((8, Cout_p), jnp.float32)
    params = params.at[0, :Cout].set(shift).at[1, :Cout].set(alpha)

    # --- NCHW -> NHWC, zero-pad spatially, flatten padded rows ---
    # TODO(synk): if the surrounding model keeps activations in NHWC, this entry
    # transpose and the exit transpose can be dropped entirely.
    x = jnp.transpose(x_nchw, (0, 2, 3, 1)).astype(compute_dtype)
    x = jnp.pad(x, ((0, 0), (pad, pad), (pad, Wp - W - pad), (0, Cin_p - Cin)))
    x = x.reshape(N, Hp * Wp, Cin_p)
    x = jnp.pad(x, ((0, 0), (0, extra), (0, 0)))

    # tap (kh, kw) reads flattened rows shifted by kh*Wp + kw
    offs = tuple(kh * Wp + kw for kh in range(kH) for kw in range(kW))
    kernel = functools.partial(_conv_bn_prelu_kernel, offs=offs, n_rows=n_rows)

    out_flat = pl.pallas_call(
        kernel,
        out_shape=jax.ShapeDtypeStruct((N, n_rows, Cout_p), jnp.float32),
        grid=(N,),                                   # one whole image per step
        in_specs=[
            pl.BlockSpec((1, L, Cin_p), lambda n: (n, 0, 0)),
            pl.BlockSpec((kH * kW, Cin_p, Cout_p), lambda n: (0, 0, 0)),
            pl.BlockSpec((8, Cout_p), lambda n: (0, 0)),
        ],
        out_specs=pl.BlockSpec((1, n_rows, Cout_p), lambda n: (n, 0, 0)),
        scratch_shapes=[pltpu.VMEM((n_rows, Cout_p), jnp.float32)],
        compiler_params=pltpu.CompilerParams(
            dimension_semantics=("parallel",),       # batch across v7x TCs
            vmem_limit_bytes=32 * 1024 * 1024,       # safe on v5e/v6e/v7x
        ),
    )(x, w_taps, params)

    # strip padded width / padded channels, back to NCHW (fuses into one XLA op)
    out = out_flat.reshape(N, H, Wp, Cout_p)[:, :, :W, :Cout]
    return jnp.transpose(out, (0, 3, 1, 2)).astype(x_nchw.dtype)


def _reference(x, weight, gamma, beta, mean, var, prelu_alpha, eps=1e-5):
    """Pure-JAX reference with the same bf16-rounded operands / f32 accumulation."""
    Cout = weight.shape[0]
    pad_h, pad_w = weight.shape[2] // 2, weight.shape[3] // 2
    inv_std = 1.0 / jnp.sqrt(var + eps)
    scale = gamma * inv_std
    shift = beta - mean * scale
    xb = x.astype(jnp.bfloat16).astype(jnp.float32)
    wb = (weight * scale[:, None, None, None]).astype(jnp.bfloat16).astype(jnp.float32)
    y = lax.conv_general_dilated(
        xb, wb, window_strides=(1, 1),
        padding=((pad_h, pad_h), (pad_w, pad_w)),
        dimension_numbers=("NCHW", "OIHW", "NCHW"),
        precision=lax.Precision.HIGHEST)
    y = y + shift[None, :, None, None]
    a = jnp.broadcast_to(jnp.asarray(prelu_alpha, jnp.float32).reshape(-1), (Cout,))
    return jnp.where(y >= 0, y, a[None, :, None, None] * y)


if __name__ == "__main__":
    # --- test 1: demo shapes, per-channel PReLU ---
    N, Cin, Cout, H, W, k = 2, 4, 8, 16, 16, 3
    key = jax.random.PRNGKey(0)
    kx, kw, kg, kb, km, kv = jax.random.split(key, 6)

    x = jax.random.normal(kx, (N, Cin, H, W), jnp.float32)
    fan_in = Cin * k * k
    weight = jax.random.normal(kw, (Cout, Cin, k, k), jnp.float32) / jnp.sqrt(fan_in)
    gamma = 1.0 + 0.1 * jax.random.normal(kg, (Cout,), jnp.float32)
    beta = 0.1 * jax.random.normal(kb, (Cout,), jnp.float32)
    running_mean = 0.1 * jax.random.normal(km, (Cout,), jnp.float32)
    running_var = jnp.abs(1.0 + 0.1 * jax.random.normal(kv, (Cout,), jnp.float32))
    prelu_alpha = jnp.full((Cout,), 0.25, jnp.float32)   # PyTorch PReLU default

    out = conv_batchnorm_prelu(x, weight, gamma, beta, running_mean,
                               running_var, prelu_alpha)
    out = jax.block_until_ready(out)
    ref = _reference(x, weight, gamma, beta, running_mean, running_var, prelu_alpha)
    assert out.shape == (N, Cout, H, W)
    assert bool(jnp.allclose(out, ref, atol=1e-2, rtol=1e-2))

    # --- test 2: odd spatial sizes + single shared PReLU parameter ---
    N2, Cin2, Cout2, H2, W2 = 1, 3, 5, 15, 13
    kx2, kw2 = jax.random.split(jax.random.PRNGKey(1), 2)
    x2 = jax.random.normal(kx2, (N2, Cin2, H2, W2), jnp.float32)
    w2 = jax.random.normal(kw2, (Cout2, Cin2, k, k), jnp.float32) / jnp.sqrt(Cin2 * k * k)
    g2 = jnp.ones((Cout2,), jnp.float32)
    b2 = jnp.zeros((Cout2,), jnp.float32)
    m2 = jnp.zeros((Cout2,), jnp.float32)
    v2 = jnp.ones((Cout2,), jnp.float32)
    a2 = jnp.full((1,), 0.1, jnp.float32)                # shared-slope PReLU

    out2 = jax.block_until_ready(
        conv_batchnorm_prelu(x2, w2, g2, b2, m2, v2, a2))
    ref2 = _reference(x2, w2, g2, b2, m2, v2, a2)
    assert out2.shape == (N2, Cout2, H2, W2)
    assert bool(jnp.allclose(out2, ref2, atol=1e-2, rtol=1e-2))

    print("KERNEL_OK")
</pallas_src>

<mosaic_0001>
module attributes {stable_mosaic.version = 11 : i64} {
  func.func @_conv_bn_prelu_kernel(%arg0: i32, %arg1: memref<1x440x8xbf16, #tpu.memory_space<vmem>>, %arg2: memref<9x8x128xbf16, #tpu.memory_space<vmem>>, %arg3: memref<8x128xf32, #tpu.memory_space<vmem>>, %arg4: memref<1x384x128xf32, #tpu.memory_space<vmem>>, %arg5: memref<384x128xf32, #tpu.memory_space<vmem>>) attributes {dimension_semantics = [#tpu.dimension_semantics<parallel>], iteration_bounds = array<i64: 2>, scalar_prefetch = 0 : i64, scratch_operands = 1 : i64, tpu.core_type = #tpu.core_type<tc>, window_params = [{transform_indices = @transform_0, window_bounds = array<i64: 1, 440, 8>}, {pipeline_mode = #tpu.pipeline_mode<synchronous>, transform_indices = @transform_1, window_bounds = array<i64: 9, 8, 128>}, {pipeline_mode = #tpu.pipeline_mode<synchronous>, transform_indices = @transform_2, window_bounds = array<i64: 8, 128>}, {transform_indices = @transform_3, window_bounds = array<i64: 1, 384, 128>}]} {
    %c0 = arith.constant 0 : index
    %c0_0 = arith.constant 0 : index
    %c0_1 = arith.constant 0 : index
    %0 = vector.load %arg1[%c0, %c0_0, %c0_1] : memref<1x440x8xbf16, #tpu.memory_space<vmem>>, vector<1x384x8xbf16>
    %1 = vector.shape_cast %0 : vector<1x384x8xbf16> to vector<384x8xbf16>
    %c0_2 = arith.constant 0 : index
    %c0_3 = arith.constant 0 : index
    %c0_4 = arith.constant 0 : index
    %2 = vector.load %arg2[%c0_2, %c0_3, %c0_4] : memref<9x8x128xbf16, #tpu.memory_space<vmem>>, vector<1x8x128xbf16>
    %3 = vector.shape_cast %2 : vector<1x8x128xbf16> to vector<8x128xbf16>
    %cst = arith.constant dense<0.000000e+00> : vector<384x128xf32>
    %4 = tpu.matmul %1, %3, %cst {dimension_numbers = #tpu.dot_dimension_numbers<[1], [0], [0], [1], [0, 0, 1, 1], [], []>} : vector<384x8xbf16>, vector<8x128xbf16>, vector<384x128xf32> -> vector<384x128xf32>
    %c0_5 = arith.constant 0 : index
    %c0_6 = arith.constant 0 : index
    %5 = vector.load %arg5[%c0_5, %c0_6] : memref<384x128xf32, #tpu.memory_space<vmem>>, vector<384x128xf32>
    tpu.vector_store %arg5[%c0_5, %c0_6], %4 {strides = array<i32>} : memref<384x128xf32, #tpu.memory_space<vmem>>, vector<384x128xf32>,
    %c0_7 = arith.constant 0 : index
    %c1 = arith.constant 1 : index
    %c0_8 = arith.constant 0 : index
    %6 = vector.load %arg1[%c0_7, %c1, %c0_8] : memref<1x440x8xbf16, #tpu.memory_space<vmem>>, vector<1x384x8xbf16>
    %7 = vector.shape_cast %6 : vector<1x384x8xbf16> to vector<384x8xbf16>
    %c1_9 = arith.constant 1 : index
    %c0_10 = arith.constant 0 : index
    %c0_11 = arith.constant 0 : index
    %8 = vector.load %arg2[%c1_9, %c0_10, %c0_11] : memref<9x8x128xbf16, #tpu.memory_space<vmem>>, vector<1x8x128xbf16>
    %9 = vector.shape_cast %8 : vector<1x8x128xbf16> to vector<8x128xbf16>
    %cst_12 = arith.constant dense<0.000000e+00> : vector<384x128xf32>
    %10 = tpu.matmul %7, %9, %cst_12 {dimension_numbers = #tpu.dot_dimension_numbers<[1], [0], [0], [1], [0, 0, 1, 1], [], []>} : vector<384x8xbf16>, vector<8x128xbf16>, vector<384x128xf32> -> vector<384x128xf32>
    %c0_13 = arith.constant 0 : index
    %c0_14 = arith.constant 0 : index
    %11 = vector.load %arg5[%c0_13, %c0_14] : memref<384x128xf32, #tpu.memory_space<vmem>>, vector<384x128xf32>
    %12 = arith.addf %11, %10 : vector<384x128xf32>
    %c0_15 = arith.constant 0 : index
    %c0_16 = arith.constant 0 : index
    %13 = vector.load %arg5[%c0_15, %c0_16] : memref<384x128xf32, #tpu.memory_space<vmem>>, vector<384x128xf32>
    tpu.vector_store %arg5[%c0_15, %c0_16], %12 {strides = array<i32>} : memref<384x128xf32, #tpu.memory_space<vmem>>, vector<384x128xf32>,
    %c0_17 = arith.constant 0 : index
    %c2 = arith.constant 2 : index
    %c0_18 = arith.constant 0 : index
    %14 = vector.load %arg1[%c0_17, %c2, %c0_18] : memref<1x440x8xbf16, #tpu.memory_space<vmem>>, vector<1x384x8xbf16>
    %15 = vector.shape_cast %14 : vector<1x384x8xbf16> to vector<384x8xbf16>
    %c2_19 = arith.constant 2 : index
    %c0_20 = arith.constant 0 : index
    %c0_21 = arith.constant 0 : index
    %16 = vector.load %arg2[%c2_19, %c0_20, %c0_21] : memref<9x8x128xbf16, #tpu.memory_space<vmem>>, vector<1x8x128xbf16>
    %17 = vector.shape_cast %16 : vector<1x8x128xbf16> to vector<8x128xbf16>
    %cst_22 = arith.constant dense<0.000000e+00> : vector<384x128xf32>
    %18 = tpu.matmul %15, %17, %cst_22 {dimension_numbers = #tpu.dot_dimension_numbers<[1], [0], [0], [1], [0, 0, 1, 1], [], []>} : vector<384x8xbf16>, vector<8x128xbf16>, vector<384x128xf32> -> vector<384x128xf32>
    %c0_23 = arith.constant 0 : index
    %c0_24 = arith.constant 0 : index
    %19 = vector.load %arg5[%c0_23, %c0_24] : memref<384x128xf32, #tpu.memory_space<vmem>>, vector<384x128xf32>
    %20 = arith.addf %19, %18 : vector<384x128xf32>
    %c0_25 = arith.constant 0 : index
    %c0_26 = arith.constant 0 : index
    %21 = vector.load %arg5[%c0_25, %c0_26] : memref<384x128xf32, #tpu.memory_space<vmem>>, vector<384x128xf32>
    tpu.vector_store %arg5[%c0_25, %c0_26], %20 {strides = array<i32>} : memref<384x128xf32, #tpu.memory_space<vmem>>, vector<384x128xf32>,
    %c0_27 = arith.constant 0 : index
    %c24 = arith.constant 24 : index
    %c0_28 = arith.constant 0 : index
    %22 = vector.load %arg1[%c0_27, %c24, %c0_28] : memref<1x440x8xbf16, #tpu.memory_space<vmem>>, vector<1x384x8xbf16>
    %23 = vector.shape_cast %22 : vector<1x384x8xbf16> to vector<384x8xbf16>
    %c3 = arith.constant 3 : index
    %c0_29 = arith.constant 0 : index
    %c0_30 = arith.constant 0 : index
    %24 = vector.load %arg2[%c3, %c0_29, %c0_30] : memref<9x8x128xbf16, #tpu.memory_space<vmem>>, vector<1x8x128xbf16>
    %25 = vector.shape_cast %24 : vector<1x8x128xbf16> to vector<8x128xbf16>
    %cst_31 = arith.constant dense<0.000000e+00> : vector<384x128xf32>
    %26 = tpu.matmul %23, %25, %cst_31 {dimension_numbers = #tpu.dot_dimension_numbers<[1], [0], [0], [1], [0, 0, 1, 1], [], []>} : vector<384x8xbf16>, vector<8x128xbf16>, vector<384x128xf32> -> vector<384x128xf32>
    %c0_32 = arith.constant 0 : index
    %c0_33 = arith.constant 0 : index
    %27 = vector.load %arg5[%c0_32, %c0_33] : memref<384x128xf32, #tpu.memory_space<vmem>>, vector<384x128xf32>
    %28 = arith.addf %27, %26 : vector<384x128xf32>
    %c0_34 = arith.constant 0 : index
    %c0_35 = arith.constant 0 : index
    %29 = vector.load %arg5[%c0_34, %c0_35] : memref<384x128xf32, #tpu.memory_space<vmem>>, vector<384x128xf32>
    tpu.vector_store %arg5[%c0_34, %c0_35], %28 {strides = array<i32>} : memref<384x128xf32, #tpu.memory_space<vmem>>, vector<384x128xf32>,
    %c0_36 = arith.constant 0 : index
    %c25 = arith.constant 25 : index
    %c0_37 = arith.constant 0 : index
    %30 = vector.load %arg1[%c0_36, %c25, %c0_37] : memref<1x440x8xbf16, #tpu.memory_space<vmem>>, vector<1x384x8xbf16>
    %31 = vector.shape_cast %30 : vector<1x384x8xbf16> to vector<384x8xbf16>
    %c4 = arith.constant 4 : index
    %c0_38 = arith.constant 0 : index
    %c0_39 = arith.constant 0 : index
    %32 = vector.load %arg2[%c4, %c0_38, %c0_39] : memref<9x8x128xbf16, #tpu.memory_space<vmem>>, vector<1x8x128xbf16>
    %33 = vector.shape_cast %32 : vector<1x8x128xbf16> to vector<8x128xbf16>
    %cst_40 = arith.constant dense<0.000000e+00> : vector<384x128xf32>
    %34 = tpu.matmul %31, %33, %cst_40 {dimension_numbers = #tpu.dot_dimension_numbers<[1], [0], [0], [1], [0, 0, 1, 1], [], []>} : vector<384x8xbf16>, vector<8x128xbf16>, vector<384x128xf32> -> vector<384x128xf32>
    %c0_41 = arith.constant 0 : index
    %c0_42 = arith.constant 0 : index
    %35 = vector.load %arg5[%c0_41, %c0_42] : memref<384x128xf32, #tpu.memory_space<vmem>>, vector<384x128xf32>
    %36 = arith.addf %35, %34 : vector<384x128xf32>
    %c0_43 = arith.constant 0 : index
    %c0_44 = arith.constant 0 : index
    %37 = vector.load %arg5[%c0_43, %c0_44] : memref<384x128xf32, #tpu.memory_space<vmem>>, vector<384x128xf32>
    tpu.vector_store %arg5[%c0_43, %c0_44], %36 {strides = array<i32>} : memref<384x128xf32, #tpu.memory_space<vmem>>, vector<384x128xf32>,
    %c0_45 = arith.constant 0 : index
    %c26 = arith.constant 26 : index
    %c0_46 = arith.constant 0 : index
    %38 = vector.load %arg1[%c0_45, %c26, %c0_46] : memref<1x440x8xbf16, #tpu.memory_space<vmem>>, vector<1x384x8xbf16>
    %39 = vector.shape_cast %38 : vector<1x384x8xbf16> to vector<384x8xbf16>
    %c5 = arith.constant 5 : index
    %c0_47 = arith.constant 0 : index
    %c0_48 = arith.constant 0 : index
    %40 = vector.load %arg2[%c5, %c0_47, %c0_48] : memref<9x8x128xbf16, #tpu.memory_space<vmem>>, vector<1x8x128xbf16>
    %41 = vector.shape_cast %40 : vector<1x8x128xbf16> to vector<8x128xbf16>
    %cst_49 = arith.constant dense<0.000000e+00> : vector<384x128xf32>
    %42 = tpu.matmul %39, %41, %cst_49 {dimension_numbers = #tpu.dot_dimension_numbers<[1], [0], [0], [1], [0, 0, 1, 1], [], []>} : vector<384x8xbf16>, vector<8x128xbf16>, vector<384x128xf32> -> vector<384x128xf32>
    %c0_50 = arith.constant 0 : index
    %c0_51 = arith.constant 0 : index
    %43 = vector.load %arg5[%c0_50, %c0_51] : memref<384x128xf32, #tpu.memory_space<vmem>>, vector<384x128xf32>
    %44 = arith.addf %43, %42 : vector<384x128xf32>
    %c0_52 = arith.constant 0 : index
    %c0_53 = arith.constant 0 : index
    %45 = vector.load %arg5[%c0_52, %c0_53] : memref<384x128xf32, #tpu.memory_space<vmem>>, vector<384x128xf32>
    tpu.vector_store %arg5[%c0_52, %c0_53], %44 {strides = array<i32>} : memref<384x128xf32, #tpu.memory_space<vmem>>, vector<384x128xf32>,
    %c0_54 = arith.constant 0 : index
    %c48 = arith.constant 48 : index
    %c0_55 = arith.constant 0 : index
    %46 = vector.load %arg1[%c0_54, %c48, %c0_55] : memref<1x440x8xbf16, #tpu.memory_space<vmem>>, vector<1x384x8xbf16>
    %47 = vector.shape_cast %46 : vector<1x384x8xbf16> to vector<384x8xbf16>
    %c6 = arith.constant 6 : index
    %c0_56 = arith.constant 0 : index
    %c0_57 = arith.constant 0 : index
    %48 = vector.load %arg2[%c6, %c0_56, %c0_57] : memref<9x8x128xbf16, #tpu.memory_space<vmem>>, vector<1x8x128xbf16>
    %49 = vector.shape_cast %48 : vector<1x8x128xbf16> to vector<8x128xbf16>
    %cst_58 = arith.constant dense<0.000000e+00> : vector<384x128xf32>
    %50 = tpu.matmul %47, %49, %cst_58 {dimension_numbers = #tpu.dot_dimension_numbers<[1], [0], [0], [1], [0, 0, 1, 1], [], []>} : vector<384x8xbf16>, vector<8x128xbf16>, vector<384x128xf32> -> vector<384x128xf32>
    %c0_59 = arith.constant 0 : index
    %c0_60 = arith.constant 0 : index
    %51 = vector.load %arg5[%c0_59, %c0_60] : memref<384x128xf32, #tpu.memory_space<vmem>>, vector<384x128xf32>
    %52 = arith.addf %51, %50 : vector<384x128xf32>
    %c0_61 = arith.constant 0 : index
    %c0_62 = arith.constant 0 : index
    %53 = vector.load %arg5[%c0_61, %c0_62] : memref<384x128xf32, #tpu.memory_space<vmem>>, vector<384x128xf32>
    tpu.vector_store %arg5[%c0_61, %c0_62], %52 {strides = array<i32>} : memref<384x128xf32, #tpu.memory_space<vmem>>, vector<384x128xf32>,
    %c0_63 = arith.constant 0 : index
    %c49 = arith.constant 49 : index
    %c0_64 = arith.constant 0 : index
    %54 = vector.load %arg1[%c0_63, %c49, %c0_64] : memref<1x440x8xbf16, #tpu.memory_space<vmem>>, vector<1x384x8xbf16>
    %55 = vector.shape_cast %54 : vector<1x384x8xbf16> to vector<384x8xbf16>
    %c7 = arith.constant 7 : index
    %c0_65 = arith.constant 0 : index
    %c0_66 = arith.constant 0 : index
    %56 = vector.load %arg2[%c7, %c0_65, %c0_66] : memref<9x8x128xbf16, #tpu.memory_space<vmem>>, vector<1x8x128xbf16>
    %57 = vector.shape_cast %56 : vector<1x8x128xbf16> to vector<8x128xbf16>
    %cst_67 = arith.constant dense<0.000000e+00> : vector<384x128xf32>
    %58 = tpu.matmul %55, %57, %cst_67 {dimension_numbers = #tpu.dot_dimension_numbers<[1], [0], [0], [1], [0, 0, 1, 1], [], []>} : vector<384x8xbf16>, vector<8x128xbf16>, vector<384x128xf32> -> vector<384x128xf32>
    %c0_68 = arith.constant 0 : index
    %c0_69 = arith.constant 0 : index
    %59 = vector.load %arg5[%c0_68, %c0_69] : memref<384x128xf32, #tpu.memory_space<vmem>>, vector<384x128xf32>
    %60 = arith.addf %59, %58 : vector<384x128xf32>
    %c0_70 = arith.constant 0 : index
    %c0_71 = arith.constant 0 : index
    %61 = vector.load %arg5[%c0_70, %c0_71] : memref<384x128xf32, #tpu.memory_space<vmem>>, vector<384x128xf32>
    tpu.vector_store %arg5[%c0_70, %c0_71], %60 {strides = array<i32>} : memref<384x128xf32, #tpu.memory_space<vmem>>, vector<384x128xf32>,
    %c0_72 = arith.constant 0 : index
    %c50 = arith.constant 50 : index
    %c0_73 = arith.constant 0 : index
    %62 = vector.load %arg1[%c0_72, %c50, %c0_73] : memref<1x440x8xbf16, #tpu.memory_space<vmem>>, vector<1x384x8xbf16>
    %63 = vector.shape_cast %62 : vector<1x384x8xbf16> to vector<384x8xbf16>
    %c8 = arith.constant 8 : index
    %c0_74 = arith.constant 0 : index
    %c0_75 = arith.constant 0 : index
    %64 = vector.load %arg2[%c8, %c0_74, %c0_75] : memref<9x8x128xbf16, #tpu.memory_space<vmem>>, vector<1x8x128xbf16>
    %65 = vector.shape_cast %64 : vector<1x8x128xbf16> to vector<8x128xbf16>
    %cst_76 = arith.constant dense<0.000000e+00> : vector<384x128xf32>
    %66 = tpu.matmul %63, %65, %cst_76 {dimension_numbers = #tpu.dot_dimension_numbers<[1], [0], [0], [1], [0, 0, 1, 1], [], []>} : vector<384x8xbf16>, vector<8x128xbf16>, vector<384x128xf32> -> vector<384x128xf32>
    %c0_77 = arith.constant 0 : index
    %c0_78 = arith.constant 0 : index
    %67 = vector.load %arg5[%c0_77, %c0_78] : memref<384x128xf32, #tpu.memory_space<vmem>>, vector<384x128xf32>
    %68 = arith.addf %67, %66 : vector<384x128xf32>
    %c0_79 = arith.constant 0 : index
    %c0_80 = arith.constant 0 : index
    %69 = vector.load %arg5[%c0_79, %c0_80] : memref<384x128xf32, #tpu.memory_space<vmem>>, vector<384x128xf32>
    tpu.vector_store %arg5[%c0_79, %c0_80], %68 {strides = array<i32>} : memref<384x128xf32, #tpu.memory_space<vmem>>, vector<384x128xf32>,
    %c0_81 = arith.constant 0 : index
    %c0_82 = arith.constant 0 : index
    %70 = vector.load %arg5[%c0_81, %c0_82] : memref<384x128xf32, #tpu.memory_space<vmem>>, vector<384x128xf32>
    %c0_83 = arith.constant 0 : index
    %c0_84 = arith.constant 0 : index
    %71 = vector.load %arg3[%c0_83, %c0_84] : memref<8x128xf32, #tpu.memory_space<vmem>>, vector<1x128xf32>
    %72 = vector.broadcast %71 : vector<1x128xf32> to vector<384x128xf32>
    %73 = arith.addf %70, %72 : vector<384x128xf32>
    %c1_85 = arith.constant 1 : index
    %c0_86 = arith.constant 0 : index
    %74 = vector.load %arg3[%c1_85, %c0_86] : memref<8x128xf32, #tpu.memory_space<vmem>>, vector<1x128xf32>
    %cst_87 = arith.constant 0.000000e+00 : f32
    %75 = vector.broadcast %cst_87 : f32 to vector<384x128xf32>
    %76 = arith.cmpf oge, %73, %75 : vector<384x128xf32>
    %77 = vector.broadcast %74 : vector<1x128xf32> to vector<384x128xf32>
    %78 = arith.mulf %77, %73 : vector<384x128xf32>
    %79 = arith.select %76, %73, %78 : vector<384x128xi1>, vector<384x128xf32>
    %c0_88 = arith.constant 0 : index
    %c0_89 = arith.constant 0 : index
    %c0_90 = arith.constant 0 : index
    %80 = vector.load %arg4[%c0_88, %c0_89, %c0_90] : memref<1x384x128xf32, #tpu.memory_space<vmem>>, vector<1x384x128xf32>
    %81 = vector.shape_cast %80 : vector<1x384x128xf32> to vector<384x128xf32>
    %82 = vector.shape_cast %79 : vector<384x128xf32> to vector<1x384x128xf32>
    tpu.vector_store %arg4[%c0_88, %c0_89, %c0_90], %82 {strides = array<i32>} : memref<1x384x128xf32, #tpu.memory_space<vmem>>, vector<1x384x128xf32>,
    return
  }
  func.func @transform_0(%arg0: i32) -> (i32, i32, i32) {
    %c0_i32 = arith.constant 0 : i32
    %c0_i32_0 = arith.constant 0 : i32
    %c0_i32_1 = arith.constant 0 : i32
    return %arg0, %c0_i32, %c0_i32_0 : i32, i32, i32
  }
  func.func @transform_1(%arg0: i32) -> (i32, i32, i32) {
    %c0_i32 = arith.constant 0 : i32
    %c0_i32_0 = arith.constant 0 : i32
    %c0_i32_1 = arith.constant 0 : i32
    %c0_i32_2 = arith.constant 0 : i32
    return %c0_i32, %c0_i32_0, %c0_i32_1 : i32, i32, i32
  }
  func.func @transform_2(%arg0: i32) -> (i32, i32) {
    %c0_i32 = arith.constant 0 : i32
    %c0_i32_0 = arith.constant 0 : i32
    %c0_i32_1 = arith.constant 0 : i32
    return %c0_i32, %c0_i32_0 : i32, i32
  }
  func.func @transform_3(%arg0: i32) -> (i32, i32, i32) {
    %c0_i32 = arith.constant 0 : i32
    %c0_i32_0 = arith.constant 0 : i32
    %c0_i32_1 = arith.constant 0 : i32
    return %arg0, %c0_i32, %c0_i32_0 : i32, i32, i32
  }
}

</mosaic_0001>

<bundles_post_ra>
// kernel: tpu_custom_call.1
= control target key start
LH: loop header
LB: loop body
LE: loop exit
PB: predicated region body
PF: predicated region fallthrough
CT: control target
= control target key end

     0   :  { %8 = vsyncpa [#allocation4], 0  ;;  %s9592_s0 = inlined_call_operand.vmem [shape: bf16[2,440,8], index: 0, kind: input, shape index: {}]   ;;  %s9593_s1 = inlined_call_operand.vmem [shape: bf16[9,8,128], index: 1, kind: input, shape index: {}]   ;;  %s9594_s2 = inlined_call_operand.vmem [shape: f32[8,128], index: 2, kind: input, shape index: {}]   ;;  %s9595_s3 = inlined_call_operand.hbm [shape: f32[2,384,128], index: 3, kind: output, shape index: {}]  }
   0x1   :  { %10 = vsyncpa [#allocation4 + $0x1], 0  ;;  %s8618_s12 = smov 0   ;;  %s8620_s13 = smov 0  }
   0x2   :  { %s8622_s14 = smov 0   ;;  %s8624_s15 = smov 0  }
   0x3 LB: > { %s8639_s16 = sadd.s32 4294967295, %s8593_s15   ;;  %s6736_s17 = sadd.s32 4294967294, %s8593_s15   ;;  %s8593_s15 = sphi %s8624_s15, %s9601_s15   ;;  %s8589_s14 = sphi %s8622_s14, %s9600_s14   ;;  %s8585_s13 = sphi %s8620_s13, %s9599_s13   ;;  %s8581_s12 = sphi %s8618_s12, %s9598_s12  }
   0x4   : > { %s8643_s18 = sadd.s32 1, %s8593_s15   ;;  %s91_s19 = sadd.s32 1, %s8589_s14 }
   0x5   : > { %s88_s20 = ssub.s32 %s8593_s15, %s8643_s18  ;;  %p101_p0 = scmp.ne.s32.totalorder %s8589_s14, %s8585_s13 }
   0x6   : > { %p89_p1 = scmp.eq.s32.totalorder %s88_s20, 0  ;;  %p102_p2 = scmp.eq.s32.totalorder %s8639_s16, 1 }
   0x7   : > { %p107_p3 = scmp.ne.s32.totalorder %s8585_s13, %s8581_s12  ;;  %p108_p4 = scmp.eq.s32.totalorder %s6736_s17, 1 }
   0x8   : > { %s8654_s21 = scalar_select %p89_p1, %s8589_s14, %s91_s19  }
   0x9   : > { %p8656_p5 = por %p102_p2, %p101_p0  ;;  %p8660_p6 = por %p108_p4, %p107_p3 }
   0xa   : > { %p6739_p7 = scmp.ge.s32.totalorder %s8593_s15, 1  ;;  %p140_p8 = scmp.lt.s32.totalorder %s8593_s15, 3 }
   0xc   : > { %p141_p9 = pnand %p6739_p7, %p140_p8 }
   0xd   : > { %v218_v0 = vld [vmem:[%s9593_s1] sm:$0xf] (!%p141_p9)  ;;  %vm412_vm0 = vcmask (!%p141_p9), 1043456   ;;  %p164_p10 = scmp.lt.s32.totalorder (!%p141_p9), %s8639_s16, 1  ;;  %v6938_v2 = vld [vmem:[%s9593_s1 + $0x10] sm:$0xf] (!%p141_p9) }
   0xe   : > { %144 = sbr.rel (%p141_p9) target bundleno = 697 (0x2b9), region = 32  ;;  %8253 = vmatprep.subr.msk.bf16.mxu1 (!%p141_p9), %vm412_vm0, %v218_v0  ;;  %v414_v1 = vsel (!%p141_p9), %vm412_vm0, %v218_v0, 0  ;;  %v6789_v3 = vld [vmem:[%s9593_s1 + $0x4] sm:$0xf] (!%p141_p9)  ;;  %8257 = vmatprep.subr.msk.bf16.mxu0 (!%p141_p9), %vm412_vm0, %v6938_v2  ;;  %v8681_v4 = vsel (!%p141_p9), %vm412_vm0, %v6938_v2, 0  ;;  %vm339_vm1 = vcmask (!%p141_p9), 64512  }
   0xf   : > { %7418 = vmatpush3.bf16.msra.mxu1 (!%p141_p9), %v414_v1  ;;  %v6988_v5 = vld [vmem:[%s9593_s1 + $0x14] sm:$0xf] (!%p141_p9)  ;;  %7618 = vmatpush3.bf16.msra.mxu0 (!%p141_p9), %v8681_v4  ;;  %v8698_v7 = vld [vmem:[%s9593_s1 + $0x8] sm:$0xf] (!%p141_p9)  ;;  %v1133_v9 = vsel (!%p141_p9), %vm412_vm0, %v6789_v3, 0  ;;  %vm1678_vm3 = vcmask (!%p141_p9), 1046528  }
  0x10   : > { %8254 = vmatprep.subr.msk.bf16.mxu1 (!%p141_p9), %vm412_vm0, %v6789_v3  ;;  %8259 = vmatprep.subr.msk.bf16.mxu0 (!%p141_p9), %vm412_vm0, %v6988_v5  ;;  %vm863_vm2 = vsmask.f32 (!%p141_p9), 7424  ;;  %v3896_v18 = vsel (!%p141_p9), %vm412_vm0, %v6988_v5, 0  ;;  %v8719_v31 = vld [vmem:[%s9593_s1 + $0x18] sm:$0xf] (!%p141_p9)  ;;  %s161_s4 = sand.u32 (!%p141_p9), 1, %s8585_s13  }
  0x11   : > { %s8263_s7 = smul.u32 (!%p141_p9), 384, %s161_s4  ;;  %s9551_s24 = scalar_lea.sflag (!%p141_p9), [#allocation4], %s161_s4 }
  0x12   : > { %s8265_s11 = smul.u32 (!%p141_p9), 6144, %s8639_s16  ;;  %s8595_s26 = smov (!%p141_p9), [#allocation3]  }
  0x13   : > { %s9385_s10 = scalar_lea.vmem (!%p141_p9), [#allocation3], %s8263_s7  ;;  %s8535_s27 = sshll.u32 (!%p141_p9), %s8595_s26, 4  ;;  %s8536_s27 = int_to_ptr.vmem [resolvable:$false] %s8535_s27 }
  0x14   : > { %s6674_s17 = sshll.u32 (!%p141_p9), %s9385_s10, 4  ;;  %s9542_s20 = scalar_lea.hbm (!%p141_p9), %s9595_s3, %s8265_s11  ;;  %s9544_s17 = int_to_ptr.vmem [resolvable:$true] %s6674_s17 }
  0x15   : > { %s165_s30 = scalar_select %p164_p10, %s8639_s16, 1 }
  0x16   : > { %s8531_s25 = scalar_lea.vmem %s9544_s17, 6144  ;;  %s8537_s28 = scalar_lea.vmem %s8536_s27, 12288 }
  0x17   : > { %s8264_s6 = smul.u32 220, %s165_s30  ;;  %p8532_p11 = scmp.ne.s32.totalorder %s9544_s17, %s8531_s25 }
  0x18   : > { %p8538_p0 = scmp.lt.s32.totalorder %s9544_s17, %s8536_s27  ;;  %p8539_p1 = scmp.lt.s32.totalorder %s8537_s28, %s8531_s25 }
  0x19   : > { %s8692_s9 = scalar_lea.vmem %s9592_s0, %s8264_s6  ;;  %p8533_p12 = pnand %p8532_p11, %p8656_p5 }
  0x1a   : > { %v8307_v6 = vld [vmem:[%s8692_s9] sm:$0xff]   ;;  %v8308_v8 = vld [vmem:[%s8692_s9 + $0x8] sm:$0xff]   ;;  %v8310_v11 = vld [vmem:[%s8692_s9 + $0x14] sm:$0xff]   ;;  %p8540_p2 = por %p8539_p1, %p8538_p0 }
  0x1b   : > { %7419 = vmatprep.mubr.msk.bf16.mxu1 %vm339_vm1, %v8307_v6  ;;  %v8309_v10 = vld [vmem:[%s8692_s9 + $0xc] sm:$0xff]   ;;  %v2968_v15 = vshll.u32 %v8310_v11, 16  ;;  %v2972_v16 = vshrl.u32 %v8310_v11, 16  ;;  %v8312_v17 = vld [vmem:[%s8692_s9 + $0x1c] sm:$0xff]   ;;  %v8314_v22 = vld [vmem:[%s8692_s9 + $0x24] sm:$0xff]   ;;  %p8534_p13 = pneg %p8533_p12 }
  0x1c   : > { %7420 = vmatmul.mubr.msk.bf16.vlgmr.msra.gmra.mrb[0].mxu1 %vm339_vm1, %v8308_v8  ;;  %v8311_v12 = vld [vmem:[%s8692_s9 + $0x10] sm:$0xff]   ;;  %v2961_v13 = vshrl.u32 %v8309_v10, 16  ;;  %v2963_v14 = vshll.u32 %v8309_v10, 16  ;;  %v8313_v21 = vld [vmem:[%s8692_s9 + $0x18] sm:$0xff]   ;;  %v2976_v23 = vshll.u32 %v8312_v17, 16  ;;  %v2980_v24 = vshrl.u32 %v8312_v17, 16 }
  0x1d   : > { %7468 = vmatpush3.bf16.msra.mxu1 %v1133_v9  ;;  %7423 = vmatprep.mubr.msk.bf16.mxu1 %vm339_vm1, %v8311_v12  ;;  %v2970_v20 = vrot.slane %v2968_v15, 1  ;;  %v2984_v27 = vshll.u32 %v8314_v22, 16  ;;  %v8315_v28 = vld [vmem:[%s8692_s9 + $0x20] sm:$0xff]   ;;  %v8316_v30 = vld [vmem:[%s8692_s9 + $0x2c] sm:$0xff]   ;;  %v2988_v34 = vshrl.u32 %v8314_v22, 16  ;;  %v8318_v38 = vld [vmem:[%s8692_s9 + $0x34] sm:$0xff]   ;;  %p8541_p3 = pnand %p8540_p2, %p8534_p13 }
  0x1e   : > { %8255 = vmatprep.subr.msk.bf16.mxu1 %vm412_vm0, %v8698_v7  ;;  %v2965_v19 = vrot.slane %v2963_v14, 1  ;;  %v2978_v29 = vrot.slane %v2976_v23, 1  ;;  %v2992_v37 = vshll.u32 %v8316_v30, 16  ;;  %v2996_v39 = vshrl.u32 %v8316_v30, 16  ;;  %v8317_v43 = vld [vmem:[%s8692_s9 + $0x28] sm:$0xff]   ;;  %v8319_v45 = vld [vmem:[%s8692_s9 + $0x30] sm:$0xff]  }
  0x1f   : > { %v2974_v26 = vor.u32 %v2972_v16, %v2970_v20  ;;  %v2986_v33 = vrot.slane %v2984_v27, 1  ;;  %v3000_v44 = vshll.u32 %v8318_v38, 16  ;;  %v8320_v46 = vld [vmem:[%s8692_s9 + $0x3c] sm:$0xff]   ;;  %v8322_v50 = vld [vmem:[%s8692_s9 + $0x44] sm:$0xff]   ;;  %v3004_v52 = vshrl.u32 %v8318_v38, 16  ;;  %v8324_v56 = vld [vmem:[%s8692_s9 + $0x4c] sm:$0xff]  }
  0x20   : > { %v2966_v25 = vor.u32 %v2965_v19, %v2961_v13  ;;  %v2982_v36 = vor.u32 %v2980_v24, %v2978_v29  ;;  %v2994_v42 = vrot.slane %v2992_v37, 1  ;;  %v3008_v49 = vshll.u32 %v8320_v46, 16  ;;  %v8326_v59 = vld [vmem:[%s8692_s9 + $0x54] sm:$0xff]   ;;  %v8323_v63 = vld [vmem:[%s8692_s9 + $0x40] sm:$0xff]   ;;  %v8325_v11 = vld [vmem:[%s8692_s9 + $0x48] sm:$0xff]  }
  0x21   : > { %v2979_v35 = vsel %vm863_vm2, %v2974_v26, %v2978_v29  ;;  %v2990_v41 = vor.u32 %v2988_v34, %v2986_v33  ;;  %v3002_v48 = vrot.slane %v3000_v44, 1  ;;  %v3012_v54 = vshrl.u32 %v8320_v46, 16  ;;  %v8321_v60 = vld [vmem:[%s8692_s9 + $0x38] sm:$0xff]   ;;  %v8330_v14 = vld [vmem:[%s8692_s9 + $0x64] sm:$0xff]   ;;  %v8327_v15 = vld [vmem:[%s8692_s9 + $0x50] sm:$0xff]  }
  0x22   : > { %v2971_v32 = vsel %vm863_vm2, %v2966_v25, %v2970_v20  ;;  %v2987_v40 = vsel %vm863_vm2, %v2982_v36, %v2986_v33  ;;  %v2998_v47 = vor.u32 %v2996_v39, %v2994_v42  ;;  %v3016_v55 = vshll.u32 %v8322_v50, 16  ;;  %v8328_v9 = vld [vmem:[%s8692_s9 + $0x5c] sm:$0xff]   ;;  %v8332_v23 = vld [vmem:[%s8692_s9 + $0x6c] sm:$0xff]  }
  0x23   : > { %7619 = vmatprep.mubr.msk.bf16.mxu0 %vm339_vm1, %v2971_v32  ;;  %v2995_v51 = vsel %vm863_vm2, %v2990_v41, %v2994_v42  ;;  %v3010_v57 = vrot.slane %v3008_v49, 1  ;;  %v3006_v58 = vor.u32 %v3004_v52, %v3002_v48  ;;  %v3024_v0 = vshll.u32 %v8324_v56, 16  ;;  %v8329_v25 = vld [vmem:[%s8692_s9 + $0x58] sm:$0xff]   ;;  %v8334_v33 = vld [vmem:[%s8692_s9 + $0xc] sm:$0xfe]   ;;  %v8340_v49 = vld [vmem:[%s8692_s9 + $0x80] sm:$0xff]  }
  0x24   : > { %7424 = vmatmul.mubr.msk.bf16.gmra.mrb[4].mxu1 %vm339_vm1, %v8313_v21  ;;  %7620 = vmatmul.mubr.msk.bf16.vlgmr.msra.gmra.mrb[0].mxu0 %vm339_vm1, %v2979_v35  ;;  %v3003_v53 = vsel %vm863_vm2, %v2998_v47, %v3002_v48  ;;  %v3018_v62 = vrot.slane %v3016_v55, 1  ;;  %v3020_v2 = vshrl.u32 %v8322_v50, 16  ;;  %v3028_v3 = vshrl.u32 %v8324_v56, 16  ;;  %v8335_v35 = vld [vmem:[%s8692_s9 + $0x14] sm:$0xff]   ;;  %v8333_v38 = vld [vmem:[%s8692_s9 + $0x68] sm:$0xff]  }
  0x25   : > { %7427 = vmatprep.mubr.msk.bf16.mxu1 %vm339_vm1, %v8315_v28  ;;  %7668 = vmatpush3.bf16.msra.mxu0 %v3896_v18  ;;  %v3014_v61 = vor.u32 %v3012_v54, %v3010_v57  ;;  %v3011_v1 = vsel %vm863_vm2, %v3006_v58, %v3010_v57  ;;  %v3032_v5 = vshll.u32 %v8326_v59, 16  ;;  %v3026_v8 = vrot.slane %v3024_v0, 1  ;;  %v8331_v28 = vld [vmem:[%s8692_s9 + $0x60] sm:$0xff]   ;;  %v8336_v41 = vld [vmem:[%s8692_s9 + $0x70] sm:$0xff]   ;;  %v8338_v47 = vld [vmem:[%s8692_s9 + $0x78] sm:$0xff]  }
  0x26   : > { %7623 = vmatprep.mubr.msk.bf16.mxu0 %vm339_vm1, %v2987_v40  ;;  %8260 = vmatprep.subr.msk.bf16.mxu0 %vm412_vm0, %v8719_v31  ;;  %v3022_v10 = vor.u32 %v3020_v2, %v3018_v62  ;;  %v3040_v16 = vshll.u32 %v8328_v9, 16  ;;  %v3036_v18 = vshrl.u32 %v8326_v59, 16  ;;  %v3044_v20 = vshrl.u32 %v8328_v9, 16  ;;  %v8343_v54 = vld [vmem:[%s8692_s9 + $0x34] sm:$0xff]   ;;  %v8342_v56 = vld [vmem:[%s8692_s9 + $0x88] sm:$0xff]   ;;  %v8345_v59 = vld [vmem:[%s8692_s9 + $0x3c] sm:$0xff]  }
  0x27   : > { %v3019_v6 = vsel %vm863_vm2, %v3014_v61, %v3018_v62  ;;  %v3030_v12 = vor.u32 %v3028_v3, %v3026_v8  ;;  %v3034_v13 = vrot.slane %v3032_v5, 1  ;;  %v3048_v21 = vshll.u32 %v8330_v14, 16  ;;  %v8347_v61 = vld [vmem:[%s8692_s9 + $0x44] sm:$0xff]   ;;  %v8349_v5 = vld [vmem:[%s8692_s9 + $0x4c] sm:$0xff]  }
  0x28   : > { %v3027_v17 = vsel %vm863_vm2, %v3022_v10, %v3026_v8  ;;  %v3042_v22 = vrot.slane %v3040_v16, 1  ;;  %v3052_v29 = vshrl.u32 %v8330_v14, 16  ;;  %v3056_v30 = vshll.u32 %v8332_v23, 16  ;;  %v8356_v2 = vld [vmem:[%s8692_s9] sm:$0xff]   ;;  %v8351_v8 = vld [vmem:[%s8692_s9 + $0x54] sm:$0xff]   ;;  %v8357_v9 = vld [vmem:[%s8692_s9 + $0x8] sm:$0xff]  }
  0x29   : > { %v3035_v19 = vsel %vm863_vm2, %v3030_v12, %v3034_v13  ;;  %v3038_v24 = vor.u32 %v3036_v18, %v3034_v13  ;;  %v3050_v27 = vrot.slane %v3048_v21, 1  ;;  %v3774_v39 = vrot.slane %v8334_v33, 1  ;;  %v8350_v12 = vld [vmem:[%s8692_s9 + $0xa8] sm:$0xff]   ;;  %v8352_v14 = vld [vmem:[%s8692_s9 + $0xb0] sm:$0xff]  }
  0x2a   : > { %v3046_v26 = vor.u32 %v3044_v20, %v3042_v22  ;;  %v8773_v37 = vrot.slane %v3056_v30, 1  ;;  %v3775_v40 = vrot.slane %v8335_v35, 1  ;;  %v4510_v52 = vsel %vm412_vm0, %v8719_v31, 0  ;;  %v8344_v31 = vld [vmem:[%s8692_s9 + $0x90] sm:$0xff]   ;;  %v8355_v20 = vld [vmem:[%s8692_s9 + $0x64] sm:$0xff]  }
  0x2b   : > { %v3043_v32 = vsel %vm863_vm2, %v3038_v24, %v3042_v22  ;;  %v3054_v36 = vor.u32 %v3052_v29, %v3050_v27  ;;  %v3783_v57 = vrot.slane %v8343_v54, 1  ;;  %v3785_v62 = vrot.slane %v8345_v59, 1  ;;  %v8359_v22 = vld [vmem:[%s8692_s9 + $0x10] sm:$0xff]  }
  0x2c   : > { %7428 = vmatmul.mubr.msk.bf16.gmra.mrb[8].mxu1 %vm339_vm1, %v8317_v43  ;;  %7624 = vmatmul.mubr.msk.bf16.gmra.mrb[4].mxu0 %vm339_vm1, %v2995_v51  ;;  %v3051_v34 = vsel %vm863_vm2, %v3046_v26, %v3050_v27  ;;  %v8337_v43 = vld [vmem:[%s8692_s9 + $0x1c] sm:$0xff]   ;;  %v3776_v44 = vsel %vm1678_vm3, %v3774_v39, %v3775_v40  ;;  %v8341_v51 = vld [vmem:[%s8692_s9 + $0x2c] sm:$0xff]   ;;  %v3787_v0 = vrot.slane %v8347_v61, 1  ;;  %v867_v10 = vshll.u32 %v8356_v2, 16 }
  0x2d   : > { %7431 = vmatprep.mubr.msk.bf16.mxu1 %vm339_vm1, %v8319_v45  ;;  %7627 = vmatprep.mubr.msk.bf16.mxu0 %vm339_vm1, %v3003_v53  ;;  %v3059_v42 = vsel %vm863_vm2, %v3054_v36, %v8773_v37  ;;  %v8339_v45 = vld [vmem:[%s8692_s9 + $0x24] sm:$0xff]   ;;  %v3777_v46 = vrot.slane %v8337_v43, 1  ;;  %v3781_v55 = vrot.slane %v8341_v51, 1  ;;  %v3786_v3 = vsel %vm1678_vm3, %v3783_v57, %v3785_v62  ;;  %v8354_v27 = vld [vmem:[%s8692_s9 + $0xb8] sm:$0xff]   ;;  %v8358_v33 = vld [vmem:[%s8692_s9 + $0x6c] sm:$0xff]  }
  0x2e   : > { %v3779_v48 = vrot.slane %v8339_v45, 1  ;;  %v3791_v13 = vrot.slane %v8351_v8, 1  ;;  %v865_v16 = vshrl.u32 %v8356_v2, 16  ;;  %v872_v18 = vshll.u32 %v8357_v9, 16  ;;  %v8366_v8 = vld [vmem:[%s8692_s9 + $0x8c] sm:$0xff]  }
  0x2f   : > { %v3778_v50 = vsel %vm1678_vm3, %v3775_v40, %v3777_v46  ;;  %v3795_v29 = vrot.slane %v8355_v20, 1  ;;  %v880_v30 = vshll.u32 %v8359_v22, 16  ;;  %v884_v36 = vshrl.u32 %v8359_v22, 16  ;;  %v8363_v40 = vld [vmem:[%s8692_s9 + $0x20] sm:$0xff]  }
  0x30   : > { %v3780_v53 = vsel %vm1678_vm3, %v3777_v46, %v3779_v48  ;;  %v3782_v58 = vsel %vm1678_vm3, %v3779_v48, %v3781_v55  ;;  %v874_v24 = vrot.slane %v872_v18, 1  ;;  %v8365_v46 = vld [vmem:[%s8692_s9 + $0x28] sm:$0xff]   ;;  %v1801_v51 = vsel %vm412_vm0, %v8698_v7, 0 }
  0x31   : > { %v900_v54 = vshrl.u32 %v8363_v40, 16  ;;  %v908_v2 = vshrl.u32 %v8365_v46, 16  ;;  %v3805_v20 = vrot.slane %v8366_v8, 1 }
  0x34   : > { %7432 = vmatmul.mubr.msk.bf16.gmra.mrb[12].mxu1 %vm339_vm1, %v8321_v60  ;;  %7628 = vmatmul.mubr.msk.bf16.gmra.mrb[8].mxu0 %vm339_vm1, %v3011_v1  ;;  %v3784_v60 = vsel %vm1678_vm3, %v3781_v55, %v3783_v57  ;;  %v8348_v1 = vld [vmem:[%s8692_s9 + $0xa0] sm:$0xff]   ;;  %v904_v55 = vshll.u32 %v8365_v46, 16  ;;  %v8374_v46 = vld [vmem:[%s8692_s9 + $0xac] sm:$0xff]  }
  0x35   : > { %7435 = vmatprep.mubr.msk.bf16.mxu1 %vm339_vm1, %v8323_v63  ;;  %7631 = vmatprep.mubr.msk.bf16.mxu0 %vm339_vm1, %v3019_v6  ;;  %v8346_v63 = vld [vmem:[%s8692_s9 + $0x98] sm:$0xff]   ;;  %v3788_v6 = vsel %vm1678_vm3, %v3785_v62, %v3787_v0 }
  0x36   : > { %v8362_v57 = vld [vmem:[%s8692_s9 + $0x7c] sm:$0xff]   ;;  %v906_v62 = vrot.slane %v904_v55, 1 }
  0x37   : > { %v8379_v55 = vld [vmem:[%s8692_s9 + $0x60] sm:$0xff]  }
  0x3c   : > { %7436 = vmatmul.mubr.msk.bf16.gmra.mrb[16].mxu1 %vm339_vm1, %v8325_v11  ;;  %7632 = vmatmul.mubr.msk.bf16.gmra.mrb[12].mxu0 %vm339_vm1, %v3027_v17  ;;  %v3789_v11 = vrot.slane %v8349_v5, 1  ;;  %v869_v17 = vrot.slane %v867_v10, 1 }
  0x3d   : > { %7439 = vmatprep.mubr.msk.bf16.mxu1 %vm339_vm1, %v8327_v15  ;;  %7635 = vmatprep.mubr.msk.bf16.mxu0 %vm339_vm1, %v3035_v19  ;;  %v8353_v15 = vld [vmem:[%s8692_s9 + $0x5c] sm:$0xff]  }
  0x3e   : > { %v3790_v19 = vsel %vm1678_vm3, %v3787_v0, %v3789_v11  ;;  %v3792_v21 = vsel %vm1678_vm3, %v3789_v11, %v3791_v13  ;;  %v870_v23 = vor.u32 %v869_v17, %v865_v16  ;;  %v3793_v26 = vrot.slane %v8353_v15, 1  ;;  %v8371_v15 = vld [vmem:[%s8692_s9 + $0x40] sm:$0xff]  }
  0x3f   : > { %v3801_v0 = vrot.slane %v8362_v57, 1  ;;  %v910_v16 = vor.u32 %v908_v2, %v906_v62  ;;  %v928_v22 = vshll.u32 %v8371_v15, 16 }
  0x40   : > { %v875_v35 = vsel %vm863_vm2, %v870_v23, %v874_v24  ;;  %v3794_v39 = vsel %vm1678_vm3, %v3791_v13, %v3793_v26 }
  0x44   : > { %7440 = vmatmul.mubr.msk.bf16.gmra.mrb[20].mxu1 %vm339_vm1, %v8329_v25  ;;  %7636 = vmatmul.mubr.msk.bf16.gmra.mrb[16].mxu0 %vm339_vm1, %v3043_v32  ;;  %v8361_v25 = vld [vmem:[%s8692_s9 + $0x18] sm:$0xff]   ;;  %v876_v32 = vshrl.u32 %v8357_v9, 16 }
  0x45   : > { %7443 = vmatprep.mubr.msk.bf16.mxu1 %vm339_vm1, %v8331_v28  ;;  %7639 = vmatprep.mubr.msk.bf16.mxu0 %vm339_vm1, %v3051_v34  ;;  %v8836_v28 = vld [vmem:[%s9593_s1 + $0x1c] sm:$0xf]  ;;  %v8360_v34 = vld [vmem:[%s8692_s9 + $0x74] sm:$0xff]  }
  0x46   : > { %v878_v43 = vor.u32 %v876_v32, %v874_v24  ;;  %v3799_v48 = vrot.slane %v8360_v34, 1  ;;  %v8370_v24 = vld [vmem:[%s8692_s9 + $0x9c] sm:$0xff]  }
  0x48   : > { %v3802_v11 = vsel %vm1678_vm3, %v3799_v48, %v3801_v0 }
  0x4c   : > { %7444 = vmatmul.mubr.msk.bf16.gmra.mrb[24].mxu1 %vm339_vm1, %v8333_v38  ;;  %7640 = vmatmul.mubr.msk.bf16.gmra.mrb[20].mxu0 %vm339_vm1, %v3059_v42  ;;  %v888_v38 = vshll.u32 %v8361_v25, 16  ;;  %v882_v42 = vrot.slane %v880_v30, 1  ;;  %v8883_v30 = vld [vmem:[%s9593_s1 + $0xc] sm:$0xf] }
  0x4d   : > { %7447 = vmatprep.mubr.msk.bf16.mxu1 %vm339_vm1, %v8336_v41  ;;  %7669 = vmatprep.mubr.msk.bf16.mxu0 %vm339_vm1, %v3776_v44  ;;  %v3796_v41 = vsel %vm1678_vm3, %v3793_v26, %v3795_v29 }
  0x4e   : > { %v886_v44 = vor.u32 %v884_v36, %v882_v42  ;;  %v890_v45 = vrot.slane %v888_v38, 1  ;;  %v8375_v36 = vld [vmem:[%s8692_s9 + $0x50] sm:$0xff]  }
  0x54   : > { %7448 = vmatmul.mubr.msk.bf16.gmra.mrb[28].mxu1 %vm339_vm1, %v8338_v47  ;;  %7670 = vmatmul.mubr.msk.bf16.vlgmr.msra.gmra.mrb[0].mxu0 %vm339_vm1, %v3778_v50  ;;  %v3797_v47 = vrot.slane %v8358_v33, 1  ;;  %v883_v50 = vsel %vm863_vm2, %v878_v43, %v882_v42  ;;  %v8372_v33 = vld [vmem:[%s8692_s9 + $0xa4] sm:$0xff]   ;;  %v3809_v42 = vrot.slane %v8370_v24, 1 }
  0x55   : > { %7451 = vmatprep.mubr.msk.bf16.mxu1 %vm339_vm1, %v8340_v49  ;;  %7718 = vmatpush3.bf16.msra.mxu0 %v4510_v52  ;;  %v896_v49 = vshll.u32 %v8363_v40, 16  ;;  %v892_v52 = vshrl.u32 %v8361_v25, 16  ;;  %v3811_v43 = vrot.slane %v8372_v33, 1  ;;  %v8389_v33 = vld [vmem:[%s8692_s9 + $0x88] sm:$0xff]  }
  0x56   : > { %7673 = vmatprep.mubr.msk.bf16.mxu0 %vm339_vm1, %v3780_v53  ;;  %8261 = vmatprep.subr.msk.bf16.mxu0 %vm412_vm0, %v8836_v28  ;;  %v891_v53 = vsel %vm863_vm2, %v886_v44, %v890_v45  ;;  %v944_v44 = vshll.u32 %v8375_v36, 16 }
  0x57   : > { %v898_v59 = vrot.slane %v896_v49, 1  ;;  %v894_v7 = vor.u32 %v892_v52, %v890_v45  ;;  %v948_v49 = vshrl.u32 %v8375_v36, 16  ;;  %v8376_v52 = vld [vmem:[%s8692_s9 + $0xb4] sm:$0xff]  }
  0x59   : > { %v902_v61 = vor.u32 %v900_v54, %v898_v59  ;;  %v899_v5 = vsel %vm863_vm2, %v894_v7, %v898_v59  ;;  %v946_v54 = vrot.slane %v944_v44, 1  ;;  %v3813_v59 = vrot.slane %v8374_v46, 1 }
  0x5a   : > { %v960_v7 = vshll.u32 %v8379_v55, 16 }
  0x5b   : > { %v950_v57 = vor.u32 %v948_v49, %v946_v54  ;;  %v8393_v49 = vld [vmem:[%s8692_s9 + $0x98] sm:$0xff]  }
  0x5c   : > { %7452 = vmatmul.mubr.msk.bf16.gmra.mrb[32].mxu1 %vm339_vm1, %v8342_v56  ;;  %7674 = vmatmul.mubr.msk.bf16.gmra.mrb[4].mxu0 %vm339_vm1, %v3782_v58  ;;  %v3798_v56 = vsel %vm1678_vm3, %v3795_v29, %v3797_v47  ;;  %v3800_v58 = vsel %vm1678_vm3, %v3797_v47, %v3799_v48  ;;  %v962_v8 = vrot.slane %v960_v7, 1  ;;  %v8953_v7 = vld [vmem:[%s9593_s1 + $0x20] sm:$0xf] }
  0x5d   : > { %7455 = vmatprep.mubr.msk.bf16.mxu1 %vm339_vm1, %v8344_v31  ;;  %7677 = vmatprep.mubr.msk.bf16.mxu0 %vm339_vm1, %v3784_v60  ;;  %v8364_v31 = vld [vmem:[%s8692_s9 + $0x84] sm:$0xff]   ;;  %v8367_v60 = vld [vmem:[%s8692_s9 + $0x30] sm:$0xff]  }
  0x5e   : > { %v916_v9 = vshrl.u32 %v8367_v60, 16 }
  0x64   : > { %7456 = vmatmul.mubr.msk.bf16.gmra.mrb[36].mxu1 %vm339_vm1, %v8346_v63  ;;  %7678 = vmatmul.mubr.msk.bf16.gmra.mrb[8].mxu0 %vm339_vm1, %v3786_v3  ;;  %v8369_v63 = vld [vmem:[%s8692_s9 + $0x38] sm:$0xff]   ;;  %v912_v3 = vshll.u32 %v8367_v60, 16  ;;  %v3815_v60 = vrot.slane %v8376_v52, 1 }
  0x65   : > { %7459 = vmatprep.mubr.msk.bf16.mxu1 %vm339_vm1, %v8348_v1  ;;  %7681 = vmatprep.mubr.msk.bf16.mxu0 %vm339_vm1, %v3788_v6  ;;  %v3803_v1 = vrot.slane %v8364_v31, 1  ;;  %v907_v6 = vsel %vm863_vm2, %v902_v61, %v906_v62  ;;  %v920_v10 = vshll.u32 %v8369_v63, 16  ;;  %v924_v25 = vshrl.u32 %v8369_v63, 16  ;;  %v8378_v62 = vld [vmem:[%s8692_s9 + $0xbc] sm:$0xff]  }
  0x66   : > { %v914_v13 = vrot.slane %v912_v3, 1  ;;  %v3814_v3 = vsel %vm1678_vm3, %v3811_v43, %v3813_v59 }
  0x67   : > { %v922_v18 = vrot.slane %v920_v10, 1  ;;  %v3806_v32 = vsel %vm1678_vm3, %v3803_v1, %v3805_v20 }
  0x68   : > { %v918_v17 = vor.u32 %v916_v9, %v914_v13  ;;  %v915_v23 = vsel %vm863_vm2, %v910_v16, %v914_v13  ;;  %v8383_v9 = vld [vmem:[%s8692_s9 + $0x70] sm:$0xff]   ;;  %v8385_v13 = vld [vmem:[%s8692_s9 + $0x78] sm:$0xff]  }
  0x69   : > { %v926_v38 = vor.u32 %v924_v25, %v922_v18  ;;  %v976_v16 = vshll.u32 %v8383_v9, 16 }
  0x6a   : > { %v923_v26 = vsel %vm863_vm2, %v918_v17, %v922_v18  ;;  %v8382_v18 = vld [vmem:[%s8692_s9 + $0xcc] ss:$0 sps:$4 sm:$0x11]  }
  0x6b   : > { %v978_v25 = vrot.slane %v976_v16, 1  ;;  %v8394_v16 = vld [vmem:[%s8692_s9 + $0x40] sm:$0xff]  }
  0x6c   : > { %7460 = vmatmul.mubr.msk.bf16.gmra.mrb[40].mxu1 %vm339_vm1, %v8350_v12  ;;  %7682 = vmatmul.mubr.msk.bf16.gmra.mrb[12].mxu0 %vm339_vm1, %v3790_v19  ;;  %v3804_v12 = vsel %vm1678_vm3, %v3801_v0, %v3803_v1  ;;  %v8373_v19 = vld [vmem:[%s8692_s9 + $0x48] sm:$0xff]   ;;  %v964_v1 = vshrl.u32 %v8379_v55, 16 }
  0x6d   : > { %7463 = vmatprep.mubr.msk.bf16.mxu1 %vm339_vm1, %v8352_v14  ;;  %7685 = vmatprep.mubr.msk.bf16.mxu0 %vm339_vm1, %v3792_v21  ;;  %v8368_v14 = vld [vmem:[%s8692_s9 + $0x94] sm:$0xff]   ;;  %v936_v29 = vshll.u32 %v8373_v19, 16  ;;  %v940_v47 = vshrl.u32 %v8373_v19, 16 }
  0x6e   : > { %v3807_v21 = vrot.slane %v8368_v14, 1  ;;  %v3817_v14 = vrot.slane %v8378_v62, 1  ;;  %v8397_v62 = vld [vmem:[%s8692_s9 + $0xa8] sm:$0xff]  }
  0x6f   : > { %v938_v40 = vrot.slane %v936_v29, 1 }
  0x70   : > { %v3808_v34 = vsel %vm1678_vm3, %v3805_v20, %v3807_v21 }
  0x74   : > { %7464 = vmatmul.mubr.msk.bf16.gmra.mrb[44].mxu1 %vm339_vm1, %v8354_v27  ;;  %7686 = vmatmul.mubr.msk.bf16.gmra.mrb[16].mxu0 %vm339_vm1, %v3794_v39  ;;  %v932_v27 = vshrl.u32 %v8371_v15, 16 }
  0x75   : > { %7469 = vmatprep.mubr.msk.bf16.mxu1 %vm339_vm1, %v875_v35  ;;  %7689 = vmatprep.mubr.msk.bf16.mxu0 %vm339_vm1, %v3796_v41  ;;  %v930_v35 = vrot.slane %v928_v22, 1  ;;  %v8377_v41 = vld [vmem:[%s8692_s9 + $0x58] sm:$0xff]   ;;  %v984_v22 = vshll.u32 %v8385_v13, 16 }
  0x76   : > { %v956_v63 = vshrl.u32 %v8377_v41, 16 }
  0x77   : > { %v934_v39 = vor.u32 %v932_v27, %v930_v35  ;;  %v931_v45 = vsel %vm863_vm2, %v926_v38, %v930_v35  ;;  %v988_v38 = vshrl.u32 %v8385_v13, 16 }
  0x79   : > { %v939_v48 = vsel %vm863_vm2, %v934_v39, %v938_v40 }
  0x7c   : > { %7470 = vmatmul.mubr.msk.bf16.vlgmr.msra.gmra.mrb[0].mxu1 %vm339_vm1, %v883_v50  ;;  %7690 = vmatmul.mubr.msk.bf16.gmra.mrb[20].mxu0 %vm339_vm1, %v3798_v56  ;;  %v952_v50 = vshll.u32 %v8377_v41, 16  ;;  %v942_v56 = vor.u32 %v940_v47, %v938_v40  ;;  %v1000_v41 = vshll.u32 %v8389_v33, 16 }
  0x7d   : > { %7473 = vmatprep.mubr.msk.bf16.mxu1 %vm339_vm1, %v891_v53  ;;  %7518 = vmatpush3.bf16.msra.mxu1 %v1801_v51  ;;  %v3810_v51 = vsel %vm1678_vm3, %v3807_v21, %v3809_v42  ;;  %v3812_v53 = vsel %vm1678_vm3, %v3809_v42, %v3811_v43  ;;  %v980_v21 = vshrl.u32 %v8383_v9, 16  ;;  %v8384_v43 = vld [vmem:[%s8692_s9 + $0x18] sm:$0xff]   ;;  %v8399_v9 = vld [vmem:[%s8692_s9 + $0xb0] sm:$0xff]  }
  0x7e   : > { %7693 = vmatprep.mubr.msk.bf16.mxu0 %vm339_vm1, %v3800_v58  ;;  %8256 = vmatprep.subr.msk.bf16.mxu1 %vm412_vm0, %v8883_v30  ;;  %v954_v31 = vrot.slane %v952_v50, 1  ;;  %v8381_v58 = vld [vmem:[%s8692_s9 + $0x68] sm:$0xff]   ;;  %v947_v61 = vsel %vm863_vm2, %v942_v56, %v946_v54  ;;  %v1016_v56 = vshll.u32 %v8393_v49, 16 }
  0x7f   : > { %v968_v2 = vshll.u32 %v8381_v58, 16  ;;  %v972_v19 = vshrl.u32 %v8381_v58, 16  ;;  %v982_v29 = vor.u32 %v980_v21, %v978_v25 }
  0x80   : > { %v955_v0 = vsel %vm863_vm2, %v950_v57, %v954_v31  ;;  %v958_v10 = vor.u32 %v956_v63, %v954_v31  ;;  %v5324_v57 = vsel %vm412_vm0, %v8836_v28, 0  ;;  %v8388_v31 = vld [vmem:[%s8692_s9 + $0x28] sm:$0xff]   ;;  %v1018_v28 = vrot.slane %v1016_v56, 1 }
  0x81   : > { %v8414_v56 = vld [vmem:[%s8692_s9 + $0x28] sm:$0xff]  }
  0x82   : > { %v963_v17 = vsel %vm863_vm2, %v958_v10, %v962_v8 }
  0x84   : > { %7474 = vmatmul.mubr.msk.bf16.gmra.mrb[4].mxu1 %vm339_vm1, %v899_v5  ;;  %7694 = vmatmul.mubr.msk.bf16.gmra.mrb[24].mxu0 %vm339_vm1, %v3802_v11  ;;  %v8380_v5 = vld [vmem:[%s8692_s9 + $0xc4] sm:$0xff]   ;;  %v966_v11 = vor.u32 %v964_v1, %v962_v8  ;;  %v1020_v1 = vshrl.u32 %v8393_v49, 16  ;;  %v8392_v8 = vld [vmem:[%s8692_s9 + $0x38] sm:$0xff]  }
  0x85   : > { %7477 = vmatprep.mubr.msk.bf16.mxu1 %vm339_vm1, %v907_v6  ;;  %7697 = vmatprep.mubr.msk.bf16.mxu0 %vm339_vm1, %v3804_v12  ;;  %v3816_v6 = vsel %vm1678_vm3, %v3813_v59, %v3815_v60  ;;  %v970_v12 = vrot.slane %v968_v2, 1  ;;  %v3819_v15 = vrot.slane %v8380_v5, 1  ;;  %v8395_v59 = vld [vmem:[%s8692_s9 + $0xa0] sm:$0xff]   ;;  %v8390_v2 = vld [vmem:[%s8692_s9 + $0x30] sm:$0xff]   ;;  %v8404_v49 = vld [vmem:[%s8692_s9 + $0x68] sm:$0xff]  }
  0x86   : > { %v1024_v63 = vshll.u32 %v8395_v59, 16  ;;  %v1028_v5 = vshrl.u32 %v8395_v59, 16  ;;  %v1688_v59 = vrot.slane %v8414_v56, 1  ;;  %v8439_v56 = vld [vmem:[%s8692_s9 + $0x88] sm:$0xff]  }
  0x87   : > { %v971_v20 = vsel %vm863_vm2, %v966_v11, %v970_v12  ;;  %v3820_v24 = vsel %vm1678_vm3, %v3817_v14, %v3819_v15  ;;  %v974_v27 = vor.u32 %v972_v19, %v970_v12  ;;  %v1022_v11 = vor.u32 %v1020_v1, %v1018_v28  ;;  %v8401_v12 = vld [vmem:[%s8692_s9 + $0xb8] sm:$0xff]  }
  0x88   : > { %v1026_v10 = vrot.slane %v1024_v63, 1  ;;  %v1044_v19 = vshrl.u32 %v8399_v9, 16 }
  0x89   : > { %v979_v36 = vsel %vm863_vm2, %v974_v27, %v978_v25  ;;  %v8403_v25 = vld [vmem:[%s8692_s9 + $0xc0] ss:$0 sps:$4 sm:$0x11]  }
  0x8a   : > { %v1030_v13 = vor.u32 %v1028_v5, %v1026_v10  ;;  %v8415_v5 = vld [vmem:[%s8692_s9 + $0x90] sm:$0xff]  }
  0x8c   : > { %7478 = vmatmul.mubr.msk.bf16.gmra.mrb[8].mxu1 %vm339_vm1, %v915_v23  ;;  %7698 = vmatmul.mubr.msk.bf16.gmra.mrb[28].mxu0 %vm339_vm1, %v3806_v32  ;;  %v3818_v23 = vsel %vm1678_vm3, %v3815_v60, %v3817_v14  ;;  %v986_v32 = vrot.slane %v984_v22, 1  ;;  %v8396_v22 = vld [vmem:[%s8692_s9 + $0x48] sm:$0xff]  }
  0x8d   : > { %7481 = vmatprep.mubr.msk.bf16.mxu1 %vm339_vm1, %v923_v26  ;;  %7701 = vmatprep.mubr.msk.bf16.mxu0 %vm339_vm1, %v3808_v34  ;;  %v8387_v26 = vld [vmem:[%s8692_s9 + $0x80] sm:$0xff]   ;;  %v3821_v34 = vrot.slane %v8382_v18, 1  ;;  %v1036_v18 = vshrl.u32 %v8397_v62, 16 }
  0x8e   : > { %v992_v35 = vshll.u32 %v8387_v26, 16  ;;  %v987_v39 = vsel %vm863_vm2, %v982_v29, %v986_v32  ;;  %v996_v40 = vshrl.u32 %v8387_v26, 16  ;;  %v990_v46 = vor.u32 %v988_v38, %v986_v32  ;;  %v8398_v32 = vld [vmem:[%s8692_s9 + $0x50] sm:$0xff]  }
  0x8f   : > { %v3822_v42 = vsel %vm1678_vm3, %v3819_v15, %v3821_v34  ;;  %v1040_v15 = vshll.u32 %v8399_v9, 16  ;;  %v1052_v29 = vshrl.u32 %v8401_v12, 16 }
  0x90   : > { %v994_v44 = vrot.slane %v992_v35, 1  ;;  %v1056_v35 = vshll.u32 %v8403_v25, 16  ;;  %v8430_v25 = vld [vmem:[%s8692_s9 + $0x68] sm:$0xff]  }
  0x92   : > { %v998_v47 = vor.u32 %v996_v40, %v994_v44  ;;  %v995_v52 = vsel %vm863_vm2, %v990_v46, %v994_v44  ;;  %v8408_v44 = vld [vmem:[%s8692_s9 + $0x10] sm:$0xff]  }
  0x94   : > { %7482 = vmatmul.mubr.msk.bf16.gmra.mrb[12].mxu1 %vm339_vm1, %v931_v45  ;;  %7702 = vmatmul.mubr.msk.bf16.gmra.mrb[32].mxu0 %vm339_vm1, %v3810_v51  ;;  %v8391_v45 = vld [vmem:[%s8692_s9 + $0x90] sm:$0xff]   ;;  %v8386_v51 = vld [vmem:[%s8692_s9 + $0x20] sm:$0xff]  }
  0x95   : > { %7485 = vmatprep.mubr.msk.bf16.mxu1 %vm339_vm1, %v939_v48  ;;  %7705 = vmatprep.mubr.msk.bf16.mxu0 %vm339_vm1, %v3812_v53  ;;  %v1002_v48 = vrot.slane %v1000_v41, 1  ;;  %v1008_v50 = vshll.u32 %v8391_v45, 16  ;;  %v1004_v53 = vshrl.u32 %v8389_v33, 16  ;;  %v1012_v55 = vshrl.u32 %v8391_v45, 16  ;;  %v8405_v33 = vld [vmem:[%s8692_s9] sm:$0xfe]  }
  0x96   : > { %v1058_v41 = vrot.slane %v1056_v35, 1  ;;  %v8402_v45 = vld [vmem:[%s8692_s9 + $0x60] sm:$0xff]  }
  0x97   : > { %v1003_v54 = vsel %vm863_vm2, %v998_v47, %v1002_v48  ;;  %v1010_v58 = vrot.slane %v1008_v50, 1  ;;  %v1006_v60 = vor.u32 %v1004_v53, %v1002_v48  ;;  %v8410_v47 = vld [vmem:[%s8692_s9 + $0x18] sm:$0xff]   ;;  %v1682_v50 = vrot.slane %v8408_v44, 1  ;;  %v8407_v53 = vld [vmem:[%s8692_s9 + $0x70] sm:$0xff]  }
  0x9c   : > { %7486 = vmatmul.mubr.msk.bf16.gmra.mrb[16].mxu1 %vm339_vm1, %v947_v61  ;;  %7706 = vmatmul.mubr.msk.bf16.gmra.mrb[36].mxu0 %vm339_vm1, %v3814_v3  ;;  %v1014_v61 = vor.u32 %v1012_v55, %v1010_v58  ;;  %v2415_v55 = vsel %vm412_vm0, %v8883_v30, 0  ;;  %v8529_v30 = vld [vmem:[%s9593_s1 + $0x10] sm:$0xf] }
  0x9d   : > { %7489 = vmatprep.mubr.msk.bf16.mxu1 %vm339_vm1, %v955_v0  ;;  %7709 = vmatprep.mubr.msk.bf16.mxu0 %vm339_vm1, %v3816_v6  ;;  %v1011_v0 = vsel %vm863_vm2, %v1006_v60, %v1010_v58  ;;  %v1032_v6 = vshll.u32 %v8397_v62, 16  ;;  %v8416_v60 = vld [vmem:[%s8692_s9 + $0x30] sm:$0xff]   ;;  %v8418_v62 = vld [vmem:[%s8692_s9 + $0x38] sm:$0xff]  }
  0x9e   : > { %v1019_v3 = vsel %vm863_vm2, %v1014_v61, %v1018_v28  ;;  %v8411_v61 = vld [vmem:[%s8692_s9 + $0x80] sm:$0xff]   ;;  %v1690_v1 = vrot.slane %v8416_v60, 1 }
  0x9f   : > { %v1034_v14 = vrot.slane %v1032_v6, 1 }
  0xa0   : > { %v1691_v6 = vsel %vm1678_vm3, %v1688_v59, %v1690_v1 }
  0xa1   : > { %v1035_v21 = vsel %vm863_vm2, %v1030_v13, %v1034_v14  ;;  %v8419_v13 = vld [vmem:[%s8692_s9 + $0xa0] sm:$0xff]  }
  0xa4   : > { %7490 = vmatmul.mubr.msk.bf16.gmra.mrb[20].mxu1 %vm339_vm1, %v963_v17  ;;  %7710 = vmatmul.mubr.msk.bf16.gmra.mrb[40].mxu0 %vm339_vm1, %v3818_v23  ;;  %v1027_v17 = vsel %vm863_vm2, %v1022_v11, %v1026_v10  ;;  %v1042_v23 = vrot.slane %v1040_v15, 1  ;;  %v8417_v10 = vld [vmem:[%s8692_s9 + $0x98] sm:$0xff]  }
  0xa5   : > { %7493 = vmatprep.mubr.msk.bf16.mxu1 %vm339_vm1, %v971_v20  ;;  %7713 = vmatprep.mubr.msk.bf16.mxu0 %vm339_vm1, %v3820_v24  ;;  %v1048_v20 = vshll.u32 %v8401_v12, 16  ;;  %v1038_v24 = vor.u32 %v1036_v18, %v1034_v14  ;;  %v8424_v14 = vld [vmem:[%s8692_s9 + $0x50] sm:$0xff]  }
  0xa6   : > { %v1046_v26 = vor.u32 %v1044_v19, %v1042_v23  ;;  %v1698_v19 = vrot.slane %v8424_v14, 1 }
  0xa7   : > { %v1050_v27 = vrot.slane %v1048_v20, 1  ;;  %v1043_v34 = vsel %vm863_vm2, %v1038_v24, %v1042_v23  ;;  %v8425_v24 = vld [vmem:[%s8692_s9 + $0xb8] sm:$0xff]  }
  0xa9   : > { %v1051_v38 = vsel %vm863_vm2, %v1046_v26, %v1050_v27  ;;  %v1054_v40 = vor.u32 %v1052_v29, %v1050_v27  ;;  %v8433_v27 = vld [vmem:[%s8692_s9 + $0x18] sm:$0xff]  }
  0xaa   : > { %v5058_v35 = vshll.u32 %v8433_v27, 16 }
  0xab   : > { %v1059_v46 = vsel %vm863_vm2, %v1054_v40, %v1058_v41  ;;  %v8435_v40 = vld [vmem:[%s8692_s9 + $0x78] sm:$0xff]   ;;  %v8429_v41 = vld [vmem:[%s8692_s9 + $0xc8] sm:$0xff]  }
  0xac   : > { %7494 = vmatmul.mubr.msk.bf16.gmra.mrb[24].mxu1 %vm339_vm1, %v979_v36  ;;  %7714 = vmatmul.mubr.msk.bf16.gmra.mrb[44].mxu0 %vm339_vm1, %v3822_v42  ;;  %v8406_v36 = vld [vmem:[%s8692_s9 + $0x8] sm:$0xff]   ;;  %v1679_v42 = vrot.slane %v8405_v33, 1  ;;  %v8427_v33 = vld [vmem:[%s8692_s9 + $0xc0] sm:$0xff]  }
  0xad   : > { %7497 = vmatprep.mubr.msk.bf16.mxu1 %vm339_vm1, %v987_v39  ;;  %7719 = vmatprep.mubr.msk.bf16.mxu0 %vm339_vm1, %v8384_v43  ;;  %v8400_v39 = vld [vmem:[%s8692_s9 + $0x58] sm:$0xff]   ;;  %v1680_v43 = vrot.slane %v8406_v36, 1 }
  0xaf   : > { %v1681_v48 = vsel %vm1678_vm3, %v1679_v42, %v1680_v43  ;;  %v5056_v42 = vshrl.u32 %v8433_v27, 16 }
  0xb4   : > { %7498 = vmatmul.mubr.msk.bf16.gmra.mrb[28].mxu1 %vm339_vm1, %v995_v52  ;;  %7720 = vmatmul.mubr.msk.bf16.vlgmr.msra.gmra.mrb[0].mxu0 %vm339_vm1, %v8386_v51  ;;  %v1684_v51 = vrot.slane %v8410_v47, 1  ;;  %v8412_v52 = vld [vmem:[%s8692_s9 + $0x20] sm:$0xff]   ;;  %v8436_v47 = vld [vmem:[%s8692_s9 + $0x28] sm:$0xff]  }
  0xb5   : > { %7501 = vmatprep.mubr.msk.bf16.mxu1 %vm339_vm1, %v1003_v54  ;;  %7768 = vmatpush3.bf16.msra.mxu0 %v5324_v57  ;;  %v1683_v54 = vsel %vm1678_vm3, %v1680_v43, %v1682_v50  ;;  %v1686_v58 = vrot.slane %v8412_v52, 1  ;;  %v5060_v43 = vrot.slane %v5058_v35, 1  ;;  %v8437_v52 = vld [vmem:[%s8692_s9 + $0x80] sm:$0xff]  }
  0xb6   : > { %7723 = vmatprep.mubr.msk.bf16.mxu0 %vm339_vm1, %v8388_v31  ;;  %8262 = vmatprep.subr.msk.bf16.mxu0 %vm412_vm0, %v8953_v7  ;;  %v1685_v57 = vsel %vm1678_vm3, %v1682_v50, %v1684_v51  ;;  %v8409_v31 = vld [vmem:[%s8692_s9 + $0x78] sm:$0xff]   ;;  %v8438_v50 = vld [vmem:[%s8692_s9 + $0x30] sm:$0xff]  }
  0xb7   : > { %v1687_v28 = vsel %vm1678_vm3, %v1684_v51, %v1686_v58  ;;  %v1689_v63 = vsel %vm1678_vm3, %v1686_v58, %v1688_v59  ;;  %v5075_v58 = vshrl.u32 %v8436_v47, 16  ;;  %v5079_v59 = vshll.u32 %v8438_v50, 16 }
  0xbc   : > { %7502 = vmatmul.mubr.msk.bf16.gmra.mrb[32].mxu1 %vm339_vm1, %v1011_v0  ;;  %7724 = vmatmul.mubr.msk.bf16.gmra.mrb[4].mxu0 %vm339_vm1, %v8390_v2  ;;  %v8413_v0 = vld [vmem:[%s8692_s9 + $0x88] sm:$0xff]   ;;  %v1692_v2 = vrot.slane %v8418_v62, 1 }
  0xbd   : > { %7505 = vmatprep.mubr.msk.bf16.mxu1 %vm339_vm1, %v1019_v3  ;;  %7727 = vmatprep.mubr.msk.bf16.mxu0 %vm339_vm1, %v8392_v8  ;;  %v8420_v3 = vld [vmem:[%s8692_s9 + $0x40] sm:$0xff]   ;;  %v8422_v8 = vld [vmem:[%s8692_s9 + $0x48] sm:$0xff]  }
  0xbe   : > { %v1693_v9 = vsel %vm1678_vm3, %v1690_v1, %v1692_v2  ;;  %v1694_v11 = vrot.slane %v8420_v3, 1  ;;  %v1696_v12 = vrot.slane %v8422_v8, 1  ;;  %v8442_v1 = vld [vmem:[%s8692_s9 + $0x40] sm:$0xff]   ;;  %v8441_v3 = vld [vmem:[%s8692_s9 + $0x90] sm:$0xff]   ;;  %v8443_v8 = vld [vmem:[%s8692_s9 + $0x98] sm:$0xff]  }
  0xbf   : > { %v5095_v14 = vshll.u32 %v8442_v1, 16 }
  0xc0   : > { %v1695_v15 = vsel %vm1678_vm3, %v1692_v2, %v1694_v11  ;;  %v1697_v18 = vsel %vm1678_vm3, %v1694_v11, %v1696_v12  ;;  %v1699_v23 = vsel %vm1678_vm3, %v1696_v12, %v1698_v19  ;;  %v5991_v11 = vsel %vm412_vm0, %v8953_v7, 0 }
  0xc4   : > { %7506 = vmatmul.mubr.msk.bf16.gmra.mrb[36].mxu1 %vm339_vm1, %v1027_v17  ;;  %7728 = vmatmul.mubr.msk.bf16.gmra.mrb[8].mxu0 %vm339_vm1, %v8394_v16  ;;  %v8421_v16 = vld [vmem:[%s8692_s9 + $0xa8] sm:$0xff]   ;;  %v8426_v17 = vld [vmem:[%s8692_s9 + $0x58] sm:$0xff]  }
  0xc5   : > { %7509 = vmatprep.mubr.msk.bf16.mxu1 %vm339_vm1, %v1035_v21  ;;  %7731 = vmatprep.mubr.msk.bf16.mxu0 %vm339_vm1, %v8396_v22  ;;  %v1700_v20 = vrot.slane %v8426_v17, 1  ;;  %v8423_v21 = vld [vmem:[%s8692_s9 + $0xb0] sm:$0xff]   ;;  %v8428_v22 = vld [vmem:[%s8692_s9 + $0x60] sm:$0xff]   ;;  %v1716_v17 = vrot.slane %v8443_v8, 1  ;;  %v8456_v8 = vld [vmem:[%s8692_s9 + $0x78] sm:$0xff]  }
  0xc6   : > { %v1702_v29 = vrot.slane %v8428_v22, 1 }
  0xc7   : > { %v1701_v26 = vsel %vm1678_vm3, %v1698_v19, %v1700_v20 }
  0xc8   : > { %v1703_v36 = vsel %vm1678_vm3, %v1700_v20, %v1702_v29  ;;  %v5097_v20 = vrot.slane %v5095_v14, 1  ;;  %v8455_v14 = vld [vmem:[%s8692_s9 + $0xc] sm:$0xff]  }
  0xcc   : > { %7510 = vmatmul.mubr.msk.bf16.gmra.mrb[40].mxu1 %vm339_vm1, %v1043_v34  ;;  %7732 = vmatmul.mubr.msk.bf16.gmra.mrb[12].mxu0 %vm339_vm1, %v8398_v32  ;;  %v1704_v32 = vrot.slane %v8430_v25, 1  ;;  %v8434_v34 = vld [vmem:[%s8692_s9 + $0x20] sm:$0xff]  }
  0xcd   : > { %7513 = vmatprep.mubr.msk.bf16.mxu1 %vm339_vm1, %v1051_v38  ;;  %7735 = vmatprep.mubr.msk.bf16.mxu0 %vm339_vm1, %v8400_v39  ;;  %v8432_v38 = vld [vmem:[%s8692_s9 + $0x70] sm:$0xff]   ;;  %v5063_v44 = vshll.u32 %v8434_v34, 16 }
  0xce   : > { %v1705_v39 = vsel %vm1678_vm3, %v1702_v29, %v1704_v32  ;;  %v5099_v29 = vshrl.u32 %v8442_v1, 16 }
  0xd4   : > { %7514 = vmatmul.mubr.msk.bf16.gmra.mrb[44].mxu1 %vm339_vm1, %v1059_v46  ;;  %7736 = vmatmul.mubr.msk.bf16.gmra.mrb[16].mxu0 %vm339_vm1, %v8402_v45  ;;  %v1706_v45 = vrot.slane %v8432_v38, 1  ;;  %v1708_v46 = vrot.slane %v8435_v40, 1  ;;  %v5101_v40 = vor.u32 %v5099_v29, %v5097_v20 }
  0xd5   : > { %7519 = vmatprep.mubr.msk.bf16.mxu1 %vm339_vm1, %v1681_v48  ;;  %7739 = vmatprep.mubr.msk.bf16.mxu0 %vm339_vm1, %v8404_v49  ;;  %v5061_v48 = vor.u32 %v5060_v43, %v5056_v42  ;;  %v5065_v49 = vrot.slane %v5063_v44, 1  ;;  %v8450_v43 = vld [vmem:[%s8692_s9 + $0x60] sm:$0xff]  }
  0xd6   : > { %v1707_v51 = vsel %vm1678_vm3, %v1704_v32, %v1706_v45 }
  0xdc   : > { %7520 = vmatmul.mubr.msk.bf16.vlgmr.msra.gmra.mrb[0].mxu1 %vm339_vm1, %v1683_v54  ;;  %7740 = vmatmul.mubr.msk.bf16.gmra.mrb[20].mxu0 %vm339_vm1, %v8407_v53  ;;  %v8431_v53 = vld [vmem:[%s8692_s9 + $0xd0] sm:$0xff]   ;;  %v1709_v54 = vsel %vm1678_vm3, %v1706_v45, %v1708_v46 }
  0xdd   : > { %7523 = vmatprep.mubr.msk.bf16.mxu1 %vm339_vm1, %v1685_v57  ;;  %7568 = vmatpush3.bf16.msra.mxu1 %v2415_v55  ;;  %v5071_v55 = vshll.u32 %v8436_v47, 16  ;;  %v5067_v57 = vshrl.u32 %v8434_v34, 16  ;;  %v8449_v45 = vld [vmem:[%s8692_s9 + $0xb0] sm:$0xff]  }
  0xde   : > { %8258 = vmatprep.subr.msk.bf16.mxu1 %vm412_vm0, %v8529_v30  ;;  %7743 = vmatprep.mubr.msk.bf16.mxu0 %vm339_vm1, %v8409_v31  ;;  %v5066_v31 = vsel %vm863_vm2, %v5061_v48, %v5065_v49  ;;  %v1710_v30 = vrot.slane %v8437_v52, 1  ;;  %v8451_v48 = vld [vmem:[%s8692_s9 + $0xb8] sm:$0xff]  }
  0xdf   : > { %v5073_v60 = vrot.slane %v5071_v55, 1  ;;  %v5069_v62 = vor.u32 %v5067_v57, %v5065_v49  ;;  %v8452_v57 = vld [vmem:[%s8692_s9 + $0x68] sm:$0xff]  }
  0xe0   : > { %v1711_v2 = vsel %vm1678_vm3, %v1708_v46, %v1710_v30 }
  0xe4   : > { %7524 = vmatmul.mubr.msk.bf16.gmra.mrb[4].mxu1 %vm339_vm1, %v1687_v28  ;;  %7744 = vmatmul.mubr.msk.bf16.gmra.mrb[24].mxu0 %vm339_vm1, %v8411_v61  ;;  %v1712_v61 = vrot.slane %v8439_v56, 1  ;;  %v8440_v28 = vld [vmem:[%s8692_s9 + $0x38] sm:$0xff]   ;;  %v1724_v56 = vrot.slane %v8451_v48, 1 }
  0xe5   : > { %7527 = vmatprep.mubr.msk.bf16.mxu1 %vm339_vm1, %v1689_v63  ;;  %7747 = vmatprep.mubr.msk.bf16.mxu0 %vm339_vm1, %v8413_v0  ;;  %v5077_v63 = vor.u32 %v5075_v58, %v5073_v60  ;;  %v5081_v0 = vrot.slane %v5079_v59, 1 }
  0xe7   : > { %v5082_v12 = vsel %vm863_vm2, %v5077_v63, %v5081_v0 }
  0xec   : > { %7528 = vmatmul.mubr.msk.bf16.gmra.mrb[8].mxu1 %vm339_vm1, %v1691_v6  ;;  %7748 = vmatmul.mubr.msk.bf16.gmra.mrb[28].mxu0 %vm339_vm1, %v8415_v5  ;;  %v1713_v5 = vsel %vm1678_vm3, %v1710_v30, %v1712_v61  ;;  %v5087_v6 = vshll.u32 %v8440_v28, 16  ;;  %v8454_v30 = vld [vmem:[%s8692_s9 + $0x70] sm:$0xff]  }
  0xed   : > { %7531 = vmatprep.mubr.msk.bf16.mxu1 %vm339_vm1, %v1693_v9  ;;  %7751 = vmatprep.mubr.msk.bf16.mxu0 %vm339_vm1, %v8417_v10  ;;  %v5074_v9 = vsel %vm863_vm2, %v5069_v62, %v5073_v60  ;;  %v5083_v10 = vshrl.u32 %v8438_v50, 16  ;;  %v5135_v62 = vshll.u32 %v8452_v57, 16 }
  0xef   : > { %v5085_v7 = vor.u32 %v5083_v10, %v5081_v0  ;;  %v5131_v0 = vshrl.u32 %v8450_v43, 16 }
  0xf4   : > { %7532 = vmatmul.mubr.msk.bf16.gmra.mrb[12].mxu1 %vm339_vm1, %v1695_v15  ;;  %7752 = vmatmul.mubr.msk.bf16.gmra.mrb[32].mxu0 %vm339_vm1, %v8419_v13  ;;  %v5091_v13 = vshrl.u32 %v8440_v28, 16  ;;  %v1714_v15 = vrot.slane %v8441_v3, 1  ;;  %v5143_v3 = vshll.u32 %v8454_v30, 16 }
  0xf5   : > { %7535 = vmatprep.mubr.msk.bf16.mxu1 %vm339_vm1, %v1697_v18  ;;  %7755 = vmatprep.mubr.msk.bf16.mxu0 %vm339_vm1, %v8421_v16  ;;  %v5089_v16 = vrot.slane %v5087_v6, 1  ;;  %v8444_v18 = vld [vmem:[%s8692_s9 + $0x48] sm:$0xff]   ;;  %v5137_v6 = vrot.slane %v5135_v62, 1 }
  0xf6   : > { %v1715_v22 = vsel %vm1678_vm3, %v1712_v61, %v1714_v15  ;;  %v5103_v25 = vshll.u32 %v8444_v18, 16  ;;  %v8453_v61 = vld [vmem:[%s8692_s9 + $0xc0] ss:$0 sps:$4 sm:$0x11]  }
  0xf7   : > { %v5093_v19 = vor.u32 %v5091_v13, %v5089_v16  ;;  %v5090_v27 = vsel %vm863_vm2, %v5085_v7, %v5089_v16  ;;  %v5155_v7 = vshrl.u32 %v8456_v8, 16 }
  0xf9   : > { %v5098_v32 = vsel %vm863_vm2, %v5093_v19, %v5097_v20 }
  0xfc   : > { %7536 = vmatmul.mubr.msk.bf16.gmra.mrb[16].mxu1 %vm339_vm1, %v1699_v23  ;;  %7756 = vmatmul.mubr.msk.bf16.gmra.mrb[36].mxu0 %vm339_vm1, %v8423_v21  ;;  %v8446_v21 = vld [vmem:[%s8692_s9 + $0x50] sm:$0xff]   ;;  %v8445_v23 = vld [vmem:[%s8692_s9 + $0xa0] sm:$0xff]  }
  0xfd   : > { %7539 = vmatprep.mubr.msk.bf16.mxu1 %vm339_vm1, %v1701_v26  ;;  %7759 = vmatprep.mubr.msk.bf16.mxu0 %vm339_vm1, %v8425_v24  ;;  %v1717_v24 = vsel %vm1678_vm3, %v1714_v15, %v1716_v17  ;;  %v8447_v26 = vld [vmem:[%s8692_s9 + $0xa8] sm:$0xff]   ;;  %v5111_v34 = vshll.u32 %v8446_v21, 16  ;;  %v1718_v35 = vrot.slane %v8445_v23, 1  ;;  %v5115_v50 = vshrl.u32 %v8446_v21, 16  ;;  %v8457_v23 = vld [vmem:[%s8692_s9 + $0x14] sm:$0xff]  }
  0xfe   : > { %v1720_v38 = vrot.slane %v8447_v26, 1  ;;  %v5151_v15 = vshll.u32 %v8456_v8, 16  ;;  %v8460_v21 = vld [vmem:[%s8692_s9 + $0x88] sm:$0xff]   ;;  %v8462_v26 = vld [vmem:[%s8692_s9 + $0x90] sm:$0xff]  }
  0xff   : > { %v5113_v42 = vrot.slane %v5111_v34, 1  ;;  %v1719_v44 = vsel %vm1678_vm3, %v1716_v17, %v1718_v35  ;;  %v5147_v17 = vshrl.u32 %v8454_v30, 16  ;;  %v5167_v29 = vshll.u32 %v8460_v21, 16 }
 0x100   : > { %v1721_v46 = vsel %vm1678_vm3, %v1718_v35, %v1720_v38  ;;  %v5153_v20 = vrot.slane %v5151_v15, 1  ;;  %v5171_v35 = vshrl.u32 %v8460_v21, 16  ;;  %v8476_v15 = vld [vmem:[%s8692_s9 + $0xc8] sm:$0xff]  }
 0x101   : > { %v5231_v21 = vshll.u32 %v8476_v15, 16 }
 0x104   : > { %7540 = vmatmul.mubr.msk.bf16.gmra.mrb[20].mxu1 %vm339_vm1, %v1703_v36  ;;  %7760 = vmatmul.mubr.msk.bf16.gmra.mrb[40].mxu0 %vm339_vm1, %v8427_v33  ;;  %v5107_v33 = vshrl.u32 %v8444_v18, 16  ;;  %v5105_v36 = vrot.slane %v5103_v25, 1 }
 0x105   : > { %7543 = vmatprep.mubr.msk.bf16.mxu1 %vm339_vm1, %v1705_v39  ;;  %7763 = vmatprep.mubr.msk.bf16.mxu0 %vm339_vm1, %v8429_v41  ;;  %v8448_v39 = vld [vmem:[%s8692_s9 + $0x58] sm:$0xff]  }
 0x106   : > { %v5109_v41 = vor.u32 %v5107_v33, %v5105_v36  ;;  %v5119_v47 = vshll.u32 %v8448_v39, 16  ;;  %v5106_v49 = vsel %vm863_vm2, %v5101_v40, %v5105_v36  ;;  %v5123_v52 = vshrl.u32 %v8448_v39, 16  ;;  %v8464_v39 = vld [vmem:[%s8692_s9 + $0x98] sm:$0xff]  }
 0x107   : > { %v5175_v36 = vshll.u32 %v8462_v26, 16 }
 0x108   : > { %v5121_v55 = vrot.slane %v5119_v47, 1 }
 0x10a   : > { %v5125_v58 = vor.u32 %v5123_v52, %v5121_v55  ;;  %v8468_v52 = vld [vmem:[%s8692_s9 + $0xa8] sm:$0xff]  }
 0x10c   : > { %7544 = vmatmul.mubr.msk.bf16.gmra.mrb[24].mxu1 %vm339_vm1, %v1707_v51  ;;  %7764 = vmatmul.mubr.msk.bf16.gmra.mrb[44].mxu0 %vm339_vm1, %v8431_v53  ;;  %v5114_v51 = vsel %vm863_vm2, %v5109_v41, %v5113_v42  ;;  %v5127_v53 = vshll.u32 %v8450_v43, 16  ;;  %v8461_v41 = vld [vmem:[%s8692_s9 + $0x24] sm:$0xff]   ;;  %v5177_v43 = vrot.slane %v5175_v36, 1  ;;  %v8479_v36 = vld [vmem:[%s8692_s9 + $0x6c] sm:$0xff]  }
 0x10d   : > { %7547 = vmatprep.mubr.msk.bf16.mxu1 %vm339_vm1, %v1709_v54  ;;  %7769 = vmatprep.mubr.msk.bf16.mxu0 %vm339_vm1, %v5066_v31  ;;  %v1722_v54 = vrot.slane %v8449_v45, 1  ;;  %v5117_v31 = vor.u32 %v5115_v50, %v5113_v42  ;;  %v8463_v45 = vld [vmem:[%s8692_s9 + $0x2c] sm:$0xff]  }
 0x10e   : > { %v5129_v59 = vrot.slane %v5127_v53, 1 }
 0x10f   : > { %v1723_v60 = vsel %vm1678_vm3, %v1720_v38, %v1722_v54  ;;  %v1725_v28 = vsel %vm1678_vm3, %v1722_v54, %v1724_v56  ;;  %v5122_v63 = vsel %vm863_vm2, %v5117_v31, %v5121_v55  ;;  %v5169_v38 = vrot.slane %v5167_v29, 1  ;;  %v8465_v54 = vld [vmem:[%s8692_s9 + $0x34] sm:$0xff]   ;;  %v8467_v31 = vld [vmem:[%s8692_s9 + $0x3c] sm:$0xff]  }
 0x110   : > { %v5130_v1 = vsel %vm863_vm2, %v5125_v58, %v5129_v59  ;;  %v5199_v58 = vshll.u32 %v8468_v52, 16 }
 0x111   : > { %v5173_v42 = vor.u32 %v5171_v35, %v5169_v38 }
 0x112   : > { %v5201_v62 = vrot.slane %v5199_v58, 1 }
 0x113   : > { %v5178_v48 = vsel %vm863_vm2, %v5173_v42, %v5177_v43  ;;  %v8482_v42 = vld [vmem:[%s8692_s9 + $0x18] sm:$0xfe]  }
 0x114   : > { %7548 = vmatmul.mubr.msk.bf16.gmra.mrb[28].mxu1 %vm339_vm1, %v1711_v2  ;;  %7770 = vmatmul.mubr.msk.bf16.vlgmr.msra.gmra.mrb[0].mxu0 %vm339_vm1, %v5074_v9  ;;  %v5139_v2 = vshrl.u32 %v8452_v57, 16  ;;  %v5133_v9 = vor.u32 %v5131_v0, %v5129_v59  ;;  %v8470_v57 = vld [vmem:[%s8692_s9 + $0xb0] sm:$0xff]  }
 0x115   : > { %7551 = vmatprep.mubr.msk.bf16.mxu1 %vm339_vm1, %v1713_v5  ;;  %7818 = vmatpush3.bf16.msra.mxu0 %v5991_v11  ;;  %v1726_v5 = vrot.slane %v8453_v61, 1  ;;  %v5145_v11 = vrot.slane %v5143_v3, 1  ;;  %v5203_v61 = vshrl.u32 %v8468_v52, 16  ;;  %v8487_v52 = vld [vmem:[%s8692_s9 + $0x30] sm:$0xff]  }
 0x116   : > { %7773 = vmatprep.mubr.msk.bf16.mxu0 %vm339_vm1, %v5082_v12  ;;  %v5141_v10 = vor.u32 %v5139_v2, %v5137_v6  ;;  %v8458_v12 = vld [vmem:[%s8692_s9 + $0x80] sm:$0xff]   ;;  %v5138_v16 = vsel %vm863_vm2, %v5133_v9, %v5137_v6  ;;  %v8471_v6 = vld [vmem:[%s8692_s9 + $0x4c] sm:$0xff]  }
 0x117   : > { %v1727_v13 = vsel %vm1678_vm3, %v1724_v56, %v1726_v5  ;;  %v5159_v19 = vshll.u32 %v8458_v12, 16  ;;  %v5163_v33 = vshrl.u32 %v8458_v12, 16  ;;  %v5205_v2 = vor.u32 %v5203_v61, %v5201_v62  ;;  %v8474_v5 = vld [vmem:[%s8692_s9 + $0xc0] sm:$0xff]  }
 0x118   : > { %v5146_v18 = vsel %vm863_vm2, %v5141_v10, %v5145_v11  ;;  %v5211_v10 = vshrl.u32 %v8470_v57, 16 }
 0x119   : > { %v5161_v25 = vrot.slane %v5159_v19, 1  ;;  %v8478_v19 = vld [vmem:[%s8692_s9 + $0xd0] sm:$0xff]  }
 0x11b   : > { %v5165_v40 = vor.u32 %v5163_v33, %v5161_v25  ;;  %v8477_v33 = vld [vmem:[%s8692_s9 + $0x64] sm:$0xff]  }
 0x11c   : > { %7552 = vmatmul.mubr.msk.bf16.gmra.mrb[32].mxu1 %vm339_vm1, %v1715_v22  ;;  %7774 = vmatmul.mubr.msk.bf16.gmra.mrb[4].mxu0 %vm339_vm1, %v5090_v27  ;;  %v5149_v22 = vor.u32 %v5147_v17, %v5145_v11  ;;  %v8459_v27 = vld [vmem:[%s8692_s9 + $0x1c] sm:$0xff]   ;;  %v8473_v17 = vld [vmem:[%s8692_s9 + $0x54] sm:$0xff]  }
 0x11d   : > { %7555 = vmatprep.mubr.msk.bf16.mxu1 %vm339_vm1, %v1717_v24  ;;  %7777 = vmatprep.mubr.msk.bf16.mxu0 %vm339_vm1, %v5098_v32  ;;  %v5157_v24 = vor.u32 %v5155_v7, %v5153_v20  ;;  %v5170_v47 = vsel %vm863_vm2, %v5165_v40, %v5169_v38 }
 0x11e   : > { %v5154_v32 = vsel %vm863_vm2, %v5149_v22, %v5153_v20  ;;  %v8475_v20 = vld [vmem:[%s8692_s9 + $0x5c] sm:$0xff]  }
 0x11f   : > { %v5162_v34 = vsel %vm863_vm2, %v5157_v24, %v5161_v25  ;;  %v5235_v25 = vshrl.u32 %v8476_v15, 16 }
 0x124   : > { %7556 = vmatmul.mubr.msk.bf16.gmra.mrb[36].mxu1 %vm339_vm1, %v1719_v44  ;;  %7778 = vmatmul.mubr.msk.bf16.gmra.mrb[8].mxu0 %vm339_vm1, %v5106_v49  ;;  %v8466_v44 = vld [vmem:[%s8692_s9 + $0xa0] sm:$0xff]   ;;  %v5187_v49 = vshrl.u32 %v8464_v39, 16 }
 0x125   : > { %7559 = vmatprep.mubr.msk.bf16.mxu1 %vm339_vm1, %v1721_v46  ;;  %7781 = vmatprep.mubr.msk.bf16.mxu0 %vm339_vm1, %v5114_v51  ;;  %v5183_v46 = vshll.u32 %v8464_v39, 16  ;;  %v5191_v50 = vshll.u32 %v8466_v44, 16  ;;  %v5195_v30 = vshrl.u32 %v8466_v44, 16  ;;  %v5243_v39 = vshrl.u32 %v8478_v19, 16 }
 0x127   : > { %v5185_v51 = vrot.slane %v5183_v46, 1  ;;  %v5193_v56 = vrot.slane %v5191_v50, 1  ;;  %v8481_v46 = vld [vmem:[%s8692_s9 + $0x74] sm:$0xff]   ;;  %v8485_v50 = vld [vmem:[%s8692_s9 + $0x28] sm:$0xff]  }
 0x129   : > { %v5189_v55 = vor.u32 %v5187_v49, %v5185_v51  ;;  %v5197_v0 = vor.u32 %v5195_v30, %v5193_v56 }
 0x12b   : > { %v5202_v9 = vsel %vm863_vm2, %v5197_v0, %v5201_v62 }
 0x12c   : > { %7560 = vmatmul.mubr.msk.bf16.gmra.mrb[40].mxu1 %vm339_vm1, %v1723_v60  ;;  %7782 = vmatmul.mubr.msk.bf16.gmra.mrb[12].mxu0 %vm339_vm1, %v5122_v63  ;;  %v5194_v60 = vsel %vm863_vm2, %v5189_v55, %v5193_v56  ;;  %v8472_v63 = vld [vmem:[%s8692_s9 + $0xb8] sm:$0xff]   ;;  %v5874_v55 = vrot.slane %v8487_v52, 1  ;;  %v8488_v56 = vld [vmem:[%s8692_s9 + $0x8c] sm:$0xff]  }
 0x12d   : > { %7563 = vmatprep.mubr.msk.bf16.mxu1 %vm339_vm1, %v1725_v28  ;;  %7785 = vmatprep.mubr.msk.bf16.mxu0 %vm339_vm1, %v5130_v1  ;;  %v5207_v28 = vshll.u32 %v8470_v57, 16  ;;  %v8469_v1 = vld [vmem:[%s8692_s9 + $0x44] sm:$0xff]   ;;  %v5215_v8 = vshll.u32 %v8472_v63, 16  ;;  %v5219_v12 = vshrl.u32 %v8472_v63, 16 }
 0x12e   : > { %v8493_v63 = vld [vmem:[%s8692_s9 + $0x48] sm:$0xff]  }
 0x12f   : > { %v5209_v3 = vrot.slane %v5207_v28, 1  ;;  %v8492_v28 = vld [vmem:[%s8692_s9 + $0x9c] sm:$0xff]  }
 0x131   : > { %v5210_v11 = vsel %vm863_vm2, %v5205_v2, %v5209_v3  ;;  %v5880_v2 = vrot.slane %v8493_v63, 1 }
 0x134   : > { %7564 = vmatmul.mubr.msk.bf16.gmra.mrb[44].mxu1 %vm339_vm1, %v1727_v13  ;;  %7786 = vmatmul.mubr.msk.bf16.gmra.mrb[16].mxu0 %vm339_vm1, %v5138_v16  ;;  %v5223_v13 = vshll.u32 %v8474_v5, 16  ;;  %v5213_v16 = vor.u32 %v5211_v10, %v5209_v3  ;;  %v8494_v3 = vld [vmem:[%s8692_s9 + $0xa4] sm:$0xff]  }
 0x135   : > { %7569 = vmatprep.mubr.msk.bf16.mxu1 %vm339_vm1, %v8455_v14  ;;  %7789 = vmatprep.mubr.msk.bf16.mxu0 %vm339_vm1, %v5146_v18  ;;  %v5217_v14 = vrot.slane %v5215_v8, 1 }
 0x136   : > { %v5225_v7 = vrot.slane %v5223_v13, 1 }
 0x137   : > { %v5221_v18 = vor.u32 %v5219_v12, %v5217_v14  ;;  %v5218_v22 = vsel %vm863_vm2, %v5213_v16, %v5217_v14  ;;  %v8504_v12 = vld [vmem:[%s8692_s9 + $0x74] sm:$0xff]   ;;  %v8500_v16 = vld [vmem:[%s8692_s9 + $0xbc] sm:$0xff]  }
 0x138   : > { %v8498_v14 = vld [vmem:[%s8692_s9 + $0xb4] sm:$0xff]  }
 0x139   : > { %v5226_v24 = vsel %vm863_vm2, %v5221_v18, %v5225_v7 }
 0x13c   : > { %7570 = vmatmul.mubr.msk.bf16.vlgmr.msra.gmra.mrb[0].mxu1 %vm339_vm1, %v8457_v23  ;;  %7790 = vmatmul.mubr.msk.bf16.gmra.mrb[20].mxu0 %vm339_vm1, %v5154_v32  ;;  %v5227_v23 = vshrl.u32 %v8474_v5, 16  ;;  %v8480_v32 = vld [vmem:[%s8692_s9 + $0xd8] ss:$0 sps:$4 sm:$0x11]  }
 0x13d   : > { %7573 = vmatprep.mubr.msk.bf16.mxu1 %vm339_vm1, %v8459_v27  ;;  %7868 = vmatpush3.bf16.msra.mxu1 %v8681_v4  ;;  %v5179_v4 = vshrl.u32 %v8462_v26, 16  ;;  %v5239_v26 = vshll.u32 %v8478_v19, 16  ;;  %v5233_v27 = vrot.slane %v5231_v21, 1  ;;  %v5247_v40 = vshll.u32 %v8480_v32, 16 }
 0x13e   : > { %7793 = vmatprep.mubr.msk.bf16.mxu0 %vm339_vm1, %v5162_v34  ;;  %v5229_v29 = vor.u32 %v5227_v23, %v5225_v7  ;;  %v3064_v7 = vshll.u32 %v8504_v12, 16  ;;  %v8506_v23 = vld [vmem:[%s8692_s9 + $0x7c] sm:$0xff]  }
 0x13f   : > { %v5181_v53 = vor.u32 %v5179_v4, %v5177_v43  ;;  %v5237_v34 = vor.u32 %v5235_v25, %v5233_v27  ;;  %v5241_v35 = vrot.slane %v5239_v26, 1  ;;  %v8483_v43 = vld [vmem:[%s8692_s9 + $0x20] sm:$0xff]  }
 0x140   : > { %v5234_v38 = vsel %vm863_vm2, %v5229_v29, %v5233_v27  ;;  %v5870_v4 = vrot.slane %v8483_v43, 1  ;;  %v3066_v25 = vrot.slane %v3064_v7, 1  ;;  %v8508_v26 = vld [vmem:[%s8692_s9 + $0x84] sm:$0xff]   ;;  %v8510_v43 = vld [vmem:[%s8692_s9 + $0x8c] sm:$0xff]  }
 0x141   : > { %v5186_v59 = vsel %vm863_vm2, %v5181_v53, %v5185_v51  ;;  %v5245_v44 = vor.u32 %v5243_v39, %v5241_v35  ;;  %v5872_v53 = vrot.slane %v8485_v50, 1  ;;  %v8502_v29 = vld [vmem:[%s8692_s9 + $0xc4] sm:$0xff]  }
 0x143   : > { %v5873_v57 = vsel %vm1678_vm3, %v5870_v4, %v5872_v53  ;;  %v5875_v58 = vsel %vm1678_vm3, %v5872_v53, %v5874_v55  ;;  %v3092_v53 = vshrl.u32 %v8510_v43, 16 }
 0x144   : > { %7574 = vmatmul.mubr.msk.bf16.gmra.mrb[4].mxu1 %vm339_vm1, %v8461_v41  ;;  %7794 = vmatmul.mubr.msk.bf16.gmra.mrb[24].mxu0 %vm339_vm1, %v5170_v47  ;;  %v5242_v41 = vsel %vm863_vm2, %v5237_v34, %v5241_v35  ;;  %v5869_v47 = vrot.slane %v8482_v42, 1  ;;  %v3068_v34 = vshrl.u32 %v8504_v12, 16  ;;  %v8507_v42 = vld [vmem:[%s8692_s9 + $0x80] sm:$0xff]  }
 0x145   : > { %7577 = vmatprep.mubr.msk.bf16.mxu1 %vm339_vm1, %v8463_v45  ;;  %7797 = vmatprep.mubr.msk.bf16.mxu0 %vm339_vm1, %v5178_v48  ;;  %v5249_v45 = vrot.slane %v5247_v40, 1  ;;  %v8484_v48 = vld [vmem:[%s8692_s9 + $0x7c] sm:$0xff]  }
 0x146   : > { %v5871_v51 = vsel %vm1678_vm3, %v5869_v47, %v5870_v4  ;;  %v8505_v40 = vld [vmem:[%s8692_s9 + $0x78] sm:$0xff]   ;;  %v8515_v12 = vld [vmem:[%s8692_s9 + $0xa0] sm:$0xff]  }
 0x147   : > { %v5250_v49 = vsel %vm863_vm2, %v5245_v44, %v5249_v45  ;;  %v3070_v44 = vor.u32 %v3068_v34, %v3066_v25  ;;  %v8512_v47 = vld [vmem:[%s8692_s9 + $0x94] sm:$0xff]   ;;  %v5892_v4 = vrot.slane %v8505_v40, 1  ;;  %v5902_v7 = vrot.slane %v8515_v12, 1 }
 0x14c   : > { %7578 = vmatmul.mubr.msk.bf16.gmra.mrb[8].mxu1 %vm339_vm1, %v8465_v54  ;;  %7798 = vmatmul.mubr.msk.bf16.gmra.mrb[28].mxu0 %vm339_vm1, %v5186_v59  ;;  %v8486_v54 = vld [vmem:[%s8692_s9 + $0x84] sm:$0xff]  }
 0x14d   : > { %7581 = vmatprep.mubr.msk.bf16.mxu1 %vm339_vm1, %v8467_v31  ;;  %7801 = vmatprep.mubr.msk.bf16.mxu0 %vm339_vm1, %v5194_v60  ;;  %v8489_v31 = vld [vmem:[%s8692_s9 + $0x38] sm:$0xff]   ;;  %v8491_v59 = vld [vmem:[%s8692_s9 + $0x40] sm:$0xff]  }
 0x14e   : > { %v5876_v30 = vrot.slane %v8489_v31, 1  ;;  %v8490_v60 = vld [vmem:[%s8692_s9 + $0x94] sm:$0xff]   ;;  %v5878_v61 = vrot.slane %v8491_v59, 1  ;;  %v8514_v59 = vld [vmem:[%s8692_s9 + $0x9c] sm:$0xff]  }
 0x150   : > { %v5877_v62 = vsel %vm1678_vm3, %v5874_v55, %v5876_v30  ;;  %v5879_v0 = vsel %vm1678_vm3, %v5876_v30, %v5878_v61  ;;  %v5881_v8 = vsel %vm1678_vm3, %v5878_v61, %v5880_v2 }
 0x154   : > { %7582 = vmatmul.mubr.msk.bf16.gmra.mrb[12].mxu1 %vm339_vm1, %v8469_v1  ;;  %7802 = vmatmul.mubr.msk.bf16.gmra.mrb[32].mxu0 %vm339_vm1, %v5202_v9  ;;  %v8495_v1 = vld [vmem:[%s8692_s9 + $0x50] sm:$0xff]   ;;  %v8497_v9 = vld [vmem:[%s8692_s9 + $0x58] sm:$0xff]  }
 0x155   : > { %7585 = vmatprep.mubr.msk.bf16.mxu1 %vm339_vm1, %v8471_v6  ;;  %7805 = vmatprep.mubr.msk.bf16.mxu0 %vm339_vm1, %v5210_v11  ;;  %v5882_v5 = vrot.slane %v8495_v1, 1  ;;  %v8496_v6 = vld [vmem:[%s8692_s9 + $0xac] sm:$0xff]   ;;  %v8499_v11 = vld [vmem:[%s8692_s9 + $0x60] sm:$0xff]   ;;  %v5884_v13 = vrot.slane %v8497_v9, 1  ;;  %v8513_v9 = vld [vmem:[%s8692_s9 + $0x98] sm:$0xff]  }
 0x156   : > { %v5886_v15 = vrot.slane %v8499_v11, 1 }
 0x157   : > { %v5883_v10 = vsel %vm1678_vm3, %v5880_v2, %v5882_v5  ;;  %v5885_v19 = vsel %vm1678_vm3, %v5882_v5, %v5884_v13  ;;  %v3100_v2 = vshrl.u32 %v8512_v47, 16  ;;  %v3108_v5 = vshrl.u32 %v8514_v59, 16 }
 0x158   : > { %v5887_v21 = vsel %vm1678_vm3, %v5884_v13, %v5886_v15  ;;  %v8518_v13 = vld [vmem:[%s8692_s9 + $0xac] sm:$0xff]  }
 0x15c   : > { %7586 = vmatmul.mubr.msk.bf16.gmra.mrb[16].mxu1 %vm339_vm1, %v8473_v17  ;;  %7806 = vmatmul.mubr.msk.bf16.gmra.mrb[36].mxu0 %vm339_vm1, %v5218_v22  ;;  %v8530_v17 = vld [vmem:[%s8692_s9 + $0x6c] sm:$0xff]  }
 0x15d   : > { %7589 = vmatprep.mubr.msk.bf16.mxu1 %vm339_vm1, %v8475_v20  ;;  %7809 = vmatprep.mubr.msk.bf16.mxu0 %vm339_vm1, %v5226_v24  ;;  %v3060_v18 = vshrl.u32 %v8530_v17, 16  ;;  %v8501_v20 = vld [vmem:[%s8692_s9 + $0x68] sm:$0xff]   ;;  %v8503_v22 = vld [vmem:[%s8692_s9 + $0x70] sm:$0xff]  }
 0x15e   : > { %v5888_v27 = vrot.slane %v8501_v20, 1  ;;  %v5890_v32 = vrot.slane %v8503_v22, 1  ;;  %v8520_v17 = vld [vmem:[%s8692_s9 + $0xb4] sm:$0xff]  }
 0x15f   : > { %v3062_v24 = vor.u32 %v3060_v18, %v8773_v37  ;;  %v5900_v18 = vrot.slane %v8513_v9, 1 }
 0x160   : > { %v5889_v39 = vsel %vm1678_vm3, %v5886_v15, %v5888_v27  ;;  %v5891_v37 = vsel %vm1678_vm3, %v5888_v27, %v5890_v32  ;;  %v5893_v55 = vsel %vm1678_vm3, %v5890_v32, %v5892_v4  ;;  %v8519_v32 = vld [vmem:[%s8692_s9 + $0xb0] sm:$0xff]  }
 0x161   : > { %v3067_v35 = vsel %vm863_vm2, %v3062_v24, %v3066_v25  ;;  %v3128_v24 = vshll.u32 %v8520_v17, 16  ;;  %v5903_v27 = vsel %vm1678_vm3, %v5900_v18, %v5902_v7  ;;  %v5906_v40 = vrot.slane %v8519_v32, 1 }
 0x164   : > { %7590 = vmatmul.mubr.msk.bf16.gmra.mrb[20].mxu1 %vm339_vm1, %v8477_v33  ;;  %7810 = vmatmul.mubr.msk.bf16.gmra.mrb[40].mxu0 %vm339_vm1, %v5234_v38  ;;  %v3072_v33 = vshll.u32 %v8506_v23, 16  ;;  %v3080_v38 = vshll.u32 %v8508_v26, 16 }
 0x165   : > { %7593 = vmatprep.mubr.msk.bf16.mxu1 %vm339_vm1, %v8479_v36  ;;  %7813 = vmatprep.mubr.msk.bf16.mxu0 %vm339_vm1, %v5242_v41  ;;  %v3076_v36 = vshrl.u32 %v8506_v23, 16  ;;  %v3124_v23 = vshrl.u32 %v8518_v13, 16 }
 0x166   : > { %v3074_v41 = vrot.slane %v3072_v33, 1  ;;  %v8522_v33 = vld [vmem:[%s8692_s9 + $0xbc] sm:$0xff]  }
 0x168   : > { %v3078_v45 = vor.u32 %v3076_v36, %v3074_v41  ;;  %v3075_v50 = vsel %vm863_vm2, %v3070_v44, %v3074_v41  ;;  %v3130_v36 = vrot.slane %v3128_v24, 1  ;;  %v3140_v44 = vshrl.u32 %v8522_v33, 16 }
 0x16c   : > { %7594 = vmatmul.mubr.msk.bf16.gmra.mrb[24].mxu1 %vm339_vm1, %v8481_v46  ;;  %7814 = vmatmul.mubr.msk.bf16.gmra.mrb[44].mxu0 %vm339_vm1, %v5250_v49  ;;  %v3082_v46 = vrot.slane %v3080_v38, 1  ;;  %v3088_v49 = vshll.u32 %v8510_v43, 16  ;;  %v8524_v38 = vld [vmem:[%s8692_s9 + $0xc4] sm:$0xff]  }
 0x16d   : > { %7597 = vmatprep.mubr.msk.bf16.mxu1 %vm339_vm1, %v8484_v48  ;;  %7819 = vmatprep.mubr.msk.bf16.mxu0 %vm339_vm1, %v5871_v51  ;;  %v5894_v48 = vrot.slane %v8507_v42, 1  ;;  %v3084_v51 = vshrl.u32 %v8508_v26, 16  ;;  %v8517_v26 = vld [vmem:[%s8692_s9 + $0xa8] sm:$0xff]   ;;  %v3132_v42 = vshrl.u32 %v8520_v17, 16 }
 0x16e   : > { %v3083_v52 = vsel %vm863_vm2, %v3078_v45, %v3082_v46  ;;  %v3090_v31 = vrot.slane %v3088_v49, 1  ;;  %v3144_v45 = vshll.u32 %v8524_v38, 16  ;;  %v8523_v49 = vld [vmem:[%s8692_s9 + $0xc0] sm:$0xff]  }
 0x16f   : > { %v3086_v30 = vor.u32 %v3084_v51, %v3082_v46  ;;  %v8526_v51 = vld [vmem:[%s8692_s9 + $0xcc] ss:$0 sps:$4 sm:$0x11]  }
 0x171   : > { %v3091_v1 = vsel %vm863_vm2, %v3086_v30, %v3090_v31  ;;  %v8525_v30 = vld [vmem:[%s8692_s9 + $0xc8] sm:$0xff]  }
 0x174   : > { %7598 = vmatmul.mubr.msk.bf16.gmra.mrb[28].mxu1 %vm339_vm1, %v8486_v54  ;;  %7820 = vmatmul.mubr.msk.bf16.vlgmr.msra.gmra.mrb[0].mxu0 %vm339_vm1, %v5873_v57  ;;  %v3096_v54 = vshll.u32 %v8512_v47, 16  ;;  %v5895_v57 = vsel %vm1678_vm3, %v5892_v4, %v5894_v48  ;;  %v8521_v47 = vld [vmem:[%s8692_s9 + $0xb8] sm:$0xff]  }
 0x175   : > { %7601 = vmatprep.mubr.msk.bf16.mxu1 %vm339_vm1, %v8488_v56  ;;  %7823 = vmatprep.mubr.msk.bf16.mxu0 %vm339_vm1, %v5875_v58  ;;  %v8509_v56 = vld [vmem:[%s8692_s9 + $0x88] sm:$0xff]   ;;  %v8511_v58 = vld [vmem:[%s8692_s9 + $0x90] sm:$0xff]  }
 0x176   : > { %v3098_v61 = vrot.slane %v3096_v54, 1  ;;  %v5898_v63 = vrot.slane %v8511_v58, 1  ;;  %v5908_v54 = vrot.slane %v8521_v47, 1 }
 0x178   : > { %v5901_v25 = vsel %vm1678_vm3, %v5898_v63, %v5900_v18 }
 0x17c   : > { %7602 = vmatmul.mubr.msk.bf16.gmra.mrb[32].mxu1 %vm339_vm1, %v8490_v60  ;;  %7824 = vmatmul.mubr.msk.bf16.gmra.mrb[4].mxu0 %vm339_vm1, %v5877_v62  ;;  %v3094_v60 = vor.u32 %v3092_v53, %v3090_v31  ;;  %v5896_v62 = vrot.slane %v8509_v56, 1  ;;  %v3146_v53 = vrot.slane %v3144_v45, 1  ;;  %v3152_v31 = vshll.u32 %v8526_v51, 16 }
 0x17d   : > { %7605 = vmatprep.mubr.msk.bf16.mxu1 %vm339_vm1, %v8492_v28  ;;  %7827 = vmatprep.mubr.msk.bf16.mxu0 %vm339_vm1, %v5879_v0  ;;  %v8516_v28 = vld [vmem:[%s8692_s9 + $0xa4] sm:$0xff]   ;;  %v3104_v0 = vshll.u32 %v8514_v59, 16  ;;  %v5909_v59 = vsel %vm1678_vm3, %v5906_v40, %v5908_v54 }
 0x17f   : > { %v3106_v11 = vrot.slane %v3104_v0, 1 }
 0x181   : > { %v3110_v15 = vor.u32 %v3108_v5, %v3106_v11 }
 0x184   : > { %7606 = vmatmul.mubr.msk.bf16.gmra.mrb[36].mxu1 %vm339_vm1, %v8494_v3  ;;  %7828 = vmatmul.mubr.msk.bf16.gmra.mrb[8].mxu0 %vm339_vm1, %v5881_v8  ;;  %v3099_v3 = vsel %vm863_vm2, %v3094_v60, %v3098_v61  ;;  %v5897_v8 = vsel %vm1678_vm3, %v5894_v48, %v5896_v62 }
 0x185   : > { %7609 = vmatprep.mubr.msk.bf16.mxu1 %vm339_vm1, %v8496_v6  ;;  %7831 = vmatprep.mubr.msk.bf16.mxu0 %vm339_vm1, %v5883_v10  ;;  %v3112_v6 = vshll.u32 %v8516_v28, 16  ;;  %v5899_v10 = vsel %vm1678_vm3, %v5896_v62, %v5898_v63  ;;  %v3154_v62 = vrot.slane %v3152_v31, 1  ;;  %v5912_v63 = vrot.slane %v8525_v30, 1 }
 0x18c   : > { %7610 = vmatmul.mubr.msk.bf16.gmra.mrb[40].mxu1 %vm339_vm1, %v8498_v14  ;;  %7832 = vmatmul.mubr.msk.bf16.gmra.mrb[12].mxu0 %vm339_vm1, %v5885_v19  ;;  %v3102_v14 = vor.u32 %v3100_v2, %v3098_v61  ;;  %v3120_v19 = vshll.u32 %v8518_v13, 16  ;;  %v8527_v61 = vld [vmem:[%s8692_s9 + $0xd0] sm:$0xff]  }
 0x18d   : > { %7613 = vmatprep.mubr.msk.bf16.mxu1 %vm339_vm1, %v8500_v16  ;;  %7835 = vmatprep.mubr.msk.bf16.mxu0 %vm339_vm1, %v5887_v21  ;;  %v3114_v16 = vrot.slane %v3112_v6, 1  ;;  %v3116_v21 = vshrl.u32 %v8516_v28, 16  ;;  %v5914_v0 = vrot.slane %v8527_v61, 1 }
 0x18e   : > { %v3107_v20 = vsel %vm863_vm2, %v3102_v14, %v3106_v11 }
 0x18f   : > { %v3115_v22 = vsel %vm863_vm2, %v3110_v15, %v3114_v16  ;;  %v3118_v34 = vor.u32 %v3116_v21, %v3114_v16  ;;  %v5915_v5 = vsel %vm1678_vm3, %v5912_v63, %v5914_v0 }
 0x194   : > { %7614 = vmatmul.mubr.msk.bf16.gmra.mrb[44].mxu1 %vm339_vm1, %v8502_v29  ;;  %7836 = vmatmul.mubr.msk.bf16.gmra.mrb[16].mxu0 %vm339_vm1, %v5889_v39  ;;  %v3122_v29 = vrot.slane %v3120_v19, 1  ;;  %v5904_v39 = vrot.slane %v8517_v26, 1 }
 0x195   : > { %7643 = vmatprep.mubr.msk.bf16.mxu1 %vm339_vm1, %v3067_v35  ;;  %7839 = vmatprep.mubr.msk.bf16.mxu0 %vm339_vm1, %v5891_v37  ;;  %v3136_v37 = vshll.u32 %v8522_v33, 16 }
 0x196   : > { %v3126_v35 = vor.u32 %v3124_v23, %v3122_v29  ;;  %v3123_v41 = vsel %vm863_vm2, %v3118_v34, %v3122_v29  ;;  %v5905_v46 = vsel %vm1678_vm3, %v5902_v7, %v5904_v39  ;;  %v5907_v4 = vsel %vm1678_vm3, %v5904_v39, %v5906_v40  ;;  %v9376_v40 = vld [vmem:[%s9594_s2 + $0x1] ss:$0 sm:$0xff] }
 0x197   : > { %v3138_v48 = vrot.slane %v3136_v37, 1 }
 0x198   : > { %v3131_v43 = vsel %vm863_vm2, %v3126_v35, %v3130_v36 }
 0x19c   : > { %7644 = vmatmul.mubr.msk.bf16.vlgmr.msra.gmra.mrb[24].mxu1 %vm339_vm1, %v3075_v50  ;;  %7840 = vmatmul.mubr.msk.bf16.gmra.mrb[20].mxu0 %vm339_vm1, %v5893_v55  ;;  %v3134_v50 = vor.u32 %v3132_v42, %v3130_v36  ;;  %v5910_v55 = vrot.slane %v8523_v49, 1  ;;  %v9369_v36 = vld [vmem:[%s9594_s2] ss:$0 sm:$0xff] }
 0x19d   : > { %7647 = vmatprep.mubr.msk.bf16.mxu1 %vm339_vm1, %v3083_v52  ;;  %7843 = vmatprep.mubr.msk.bf16.mxu0 %vm339_vm1, %v5895_v57  ;;  %v3142_v52 = vor.u32 %v3140_v44, %v3138_v48  ;;  %v3148_v57 = vshrl.u32 %v8524_v38, 16 }
 0x19e   : > { %v3139_v56 = vsel %vm863_vm2, %v3134_v50, %v3138_v48  ;;  %v5911_v60 = vsel %vm1678_vm3, %v5908_v54, %v5910_v55  ;;  %v5913_v2 = vsel %vm1678_vm3, %v5910_v55, %v5912_v63 }
 0x19f   : > { %v3147_v58 = vsel %vm863_vm2, %v3142_v52, %v3146_v53  ;;  %v3150_v28 = vor.u32 %v3148_v57, %v3146_v53 }
 0x1a4   : > { %7648 = vmatmul.mubr.msk.bf16.gmra.mrb[28].mxu1 %vm339_vm1, %v3091_v1  ;;  %7844 = vmatmul.mubr.msk.bf16.gmra.mrb[24].mxu0 %vm339_vm1, %v5897_v8  ;;  %v3155_v1 = vsel %vm863_vm2, %v3150_v28, %v3154_v62 }
 0x1a5   : > { %7651 = vmatprep.mubr.msk.bf16.mxu1 %vm339_vm1, %v3099_v3  ;;  %7847 = vmatprep.mubr.msk.bf16.mxu0 %vm339_vm1, %v5899_v10  ;;  %v8528_v3 = vld [vmem:[%s8692_s9 + $0xd8] ss:$0 sps:$4 sm:$0x11]  }
 0x1a6   : > { %v5916_v6 = vrot.slane %v8528_v3, 1 }
 0x1a8   : > { %v5917_v8 = vsel %vm1678_vm3, %v5914_v0, %v5916_v6 }
 0x1ac   : > { %7652 = vmatmul.mubr.msk.bf16.gmra.mrb[32].mxu1 %vm339_vm1, %v3107_v20  ;;  %7848 = vmatmul.mubr.msk.bf16.gmra.mrb[28].mxu0 %vm339_vm1, %v5901_v25 }
 0x1ad   : > { %7655 = vmatprep.mubr.msk.bf16.mxu1 %vm339_vm1, %v3115_v22  ;;  %7851 = vmatprep.mubr.msk.bf16.mxu0 %vm339_vm1, %v5903_v27 }
 0x1b4   : > { %7656 = vmatmul.mubr.msk.bf16.gmra.mrb[36].mxu1 %vm339_vm1, %v3123_v41  ;;  %7852 = vmatmul.mubr.msk.bf16.gmra.mrb[32].mxu0 %vm339_vm1, %v5905_v46 }
 0x1b5   : > { %7659 = vmatprep.mubr.msk.bf16.mxu1 %vm339_vm1, %v3131_v43  ;;  %7855 = vmatprep.mubr.msk.bf16.mxu0 %vm339_vm1, %v5907_v4 }
 0x1bc   : > { %7660 = vmatmul.mubr.msk.bf16.gmra.mrb[40].mxu1 %vm339_vm1, %v3139_v56  ;;  %7856 = vmatmul.mubr.msk.bf16.gmra.mrb[36].mxu0 %vm339_vm1, %v5909_v59 }
 0x1bd   : > { %7663 = vmatprep.mubr.msk.bf16.mxu1 %vm339_vm1, %v3147_v58  ;;  %7859 = vmatprep.mubr.msk.bf16.mxu0 %vm339_vm1, %v5911_v60 }
 0x1c4   : > { %7664 = vmatmul.mubr.msk.bf16.gmra.mrb[44].mxu1 %vm339_vm1, %v3155_v1  ;;  %7860 = vmatmul.mubr.msk.bf16.gmra.mrb[40].mxu0 %vm339_vm1, %v5913_v2 }
 0x1c5   : > { %7863 = vmatprep.mubr.msk.bf16.mxu0 %vm339_vm1, %v5915_v5 }
 0x1cc   : > { %7864 = vmatmul.mubr.msk.bf16.gmra.mrb[44].mxu0 %vm339_vm1, %v5917_v8 }
 0x20f   : > { %v7571_v9 = vpop.f32.mrb[0].mxu1 }
 0x210   : > { %v2451_v10 = vpop.f32.mrb[1].mxu1 }
 0x211   : > { %v7572_v11 = vpop.f32.mrb[2].mxu1 }
 0x212   : > { %v2454_v12 = vpop.f32.mrb[3].mxu1 }
 0x217   : > { %v7575_v13 = vpop.f32.mrb[4].mxu1 }
 0x218   : > { %v2467_v14 = vpop.f32.mrb[5].mxu1 }
 0x219   : > { %v7576_v15 = vpop.f32.mrb[6].mxu1 }
 0x21a   : > { %v2470_v16 = vpop.f32.mrb[7].mxu1 }
 0x21f   : > { %v9333_v17 = vpop.f32.mrb[8].mxu1 }
 0x220   : > { %v9335_v18 = vpop.f32.mrb[9].mxu1 }
 0x221   : > { %v9337_v7 = vpop.f32.mrb[10].mxu1 }
 0x222   : > { %v9339_v19 = vpop.f32.mrb[11].mxu1 }
 0x227   : > { %v9341_v20 = vpop.f32.mrb[12].mxu1 }
 0x228   : > { %v9343_v21 = vpop.f32.mrb[13].mxu1 }
 0x229   : > { %v9345_v22 = vpop.f32.mrb[14].mxu1 }
 0x22a   : > { %v9347_v23 = vpop.f32.mrb[15].mxu1 }
 0x22f   : > { %v9349_v24 = vpop.f32.mrb[16].mxu1 }
 0x230   : > { %v9351_v25 = vpop.f32.mrb[17].mxu1 }
 0x231   : > { %v9353_v26 = vpop.f32.mrb[18].mxu1 }
 0x232   : > { %v9355_v27 = vpop.f32.mrb[19].mxu1 }
 0x237   : > { %v9357_v29 = vpop.f32.mrb[20].mxu1 }
 0x238   : > { %v9359_v32 = vpop.f32.mrb[21].mxu1 }
 0x239   : > { %v9361_v33 = vpop.f32.mrb[22].mxu1 }
 0x23a   : > { %v9363_v34 = vpop.f32.mrb[23].mxu1 }
 0x247   : > { %v7821_v35 = vpop.f32.mrb[0].mxu0 }
 0x248   : > { %v7869_v38 = vadd.f32 %v7821_v35, %v7571_v9  ;;  %v6027_v39 = vpop.f32.mrb[1].mxu0 }
 0x249   : > { %v7870_v37 = vadd.f32 %v6027_v39, %v2451_v10  ;;  %v7822_v41 = vpop.f32.mrb[2].mxu0 }
 0x24a   : > { %v6417_v42 = vadd.f32 %v7869_v38, %v9369_v36  ;;  %v7871_v43 = vadd.f32 %v7822_v41, %v7572_v11  ;;  %v6030_v44 = vpop.f32.mrb[3].mxu0 }
 0x24b   : > { %v6415_v45 = vadd.f32 %v7870_v37, %v9369_v36  ;;  %v7872_v46 = vadd.f32 %v6030_v44, %v2454_v12 }
 0x24c   : > { %vm6466_vm4 = vcmp.ge.f32.partialorder %v6417_v42, 0.0  ;;  %v6518_v47 = vmul.f32 %v9376_v40, %v6417_v42  ;;  %v6418_v4 = vadd.f32 %v7871_v43, %v9369_v36 }
 0x24d   : > { %vm6464_vm5 = vcmp.ge.f32.partialorder %v6415_v45, 0.0  ;;  %v6516_v48 = vmul.f32 %v9376_v40, %v6415_v45  ;;  %v6416_v49 = vadd.f32 %v7872_v46, %v9369_v36 }
 0x24e   : > { %v6566_v50 = vsel %vm6466_vm4, %v6417_v42, %v6518_v47  ;;  %vm6467_vm6 = vcmp.ge.f32.partialorder %v6418_v4, 0.0  ;;  %v6519_v51 = vmul.f32 %v9376_v40, %v6418_v4 }
 0x24f   : > { %6614 = vst [vmem:[%s9385_s10 + $0x10] sm:$0xff] %v6566_v50  ;;  %v6564_v52 = vsel %vm6464_vm5, %v6415_v45, %v6516_v48  ;;  %vm6465_vm7 = vcmp.ge.f32.partialorder %v6416_v49, 0.0  ;;  %v6517_v53 = vmul.f32 %v9376_v40, %v6416_v49  ;;  %v7825_v54 = vpop.f32.mrb[4].mxu0 }
 0x250   : > { %6612 = vst [vmem:[%s9385_s10] sm:$0xff] %v6564_v52  ;;  %v6567_v55 = vsel %vm6467_vm6, %v6418_v4, %v6519_v51  ;;  %v7873_v56 = vadd.f32 %v7825_v54, %v7575_v13  ;;  %v6043_v57 = vpop.f32.mrb[5].mxu0 }
 0x251   : > { %6615 = vst [vmem:[%s9385_s10 + $0x18] sm:$0xff] %v6567_v55  ;;  %v6565_v31 = vsel %vm6465_vm7, %v6416_v49, %v6517_v53  ;;  %v7874_v58 = vadd.f32 %v6043_v57, %v2467_v14  ;;  %v7826_v59 = vpop.f32.mrb[6].mxu0 }
 0x252   : > { %6613 = vst [vmem:[%s9385_s10 + $0x8] sm:$0xff] %v6565_v31  ;;  %v6421_v30 = vadd.f32 %v7873_v56, %v9369_v36  ;;  %v7875_v60 = vadd.f32 %v7826_v59, %v7576_v15  ;;  %v6046_v61 = vpop.f32.mrb[7].mxu0 }
 0x253   : > { %v6419_v28 = vadd.f32 %v7874_v58, %v9369_v36  ;;  %v7876_v62 = vadd.f32 %v6046_v61, %v2470_v16 }
 0x254   : > { %vm6470_vm8 = vcmp.ge.f32.partialorder %v6421_v30, 0.0  ;;  %v6522_v63 = vmul.f32 %v9376_v40, %v6421_v30  ;;  %v6422_v0 = vadd.f32 %v7875_v60, %v9369_v36 }
 0x255   : > { %vm6468_vm9 = vcmp.ge.f32.partialorder %v6419_v28, 0.0  ;;  %v6520_v1 = vmul.f32 %v9376_v40, %v6419_v28  ;;  %v6420_v2 = vadd.f32 %v7876_v62, %v9369_v36 }
 0x256   : > { %v6570_v3 = vsel %vm6470_vm8, %v6421_v30, %v6522_v63  ;;  %vm6471_vm10 = vcmp.ge.f32.partialorder %v6422_v0, 0.0  ;;  %v6523_v5 = vmul.f32 %v9376_v40, %v6422_v0 }
 0x257   : > { %6618 = vst [vmem:[%s9385_s10 + $0x30] sm:$0xff] %v6570_v3  ;;  %v6568_v6 = vsel %vm6468_vm9, %v6419_v28, %v6520_v1  ;;  %vm6469_vm11 = vcmp.ge.f32.partialorder %v6420_v2, 0.0  ;;  %v6521_v8 = vmul.f32 %v9376_v40, %v6420_v2  ;;  %v7829_v9 = vpop.f32.mrb[8].mxu0 }
 0x258   : > { %6616 = vst [vmem:[%s9385_s10 + $0x20] sm:$0xff] %v6568_v6  ;;  %v6571_v10 = vsel %vm6471_vm10, %v6422_v0, %v6523_v5  ;;  %v7877_v11 = vadd.f32 %v7829_v9, %v9333_v17  ;;  %v6059_v12 = vpop.f32.mrb[9].mxu0 }
 0x259   : > { %6619 = vst [vmem:[%s9385_s10 + $0x38] sm:$0xff] %v6571_v10  ;;  %v6569_v13 = vsel %vm6469_vm11, %v6420_v2, %v6521_v8  ;;  %v7878_v14 = vadd.f32 %v6059_v12, %v9335_v18  ;;  %v7830_v15 = vpop.f32.mrb[10].mxu0 }
 0x25a   : > { %6617 = vst [vmem:[%s9385_s10 + $0x28] sm:$0xff] %v6569_v13  ;;  %v6425_v16 = vadd.f32 %v7877_v11, %v9369_v36  ;;  %v7879_v35 = vadd.f32 %v7830_v15, %v9337_v7  ;;  %v6062_v38 = vpop.f32.mrb[11].mxu0 }
 0x25b   : > { %v6423_v39 = vadd.f32 %v7878_v14, %v9369_v36  ;;  %v7880_v37 = vadd.f32 %v6062_v38, %v9339_v19 }
 0x25c   : > { %vm6474_vm12 = vcmp.ge.f32.partialorder %v6425_v16, 0.0  ;;  %v6526_v17 = vmul.f32 %v9376_v40, %v6425_v16  ;;  %v6426_v41 = vadd.f32 %v7879_v35, %v9369_v36 }
 0x25d   : > { %vm6472_vm13 = vcmp.ge.f32.partialorder %v6423_v39, 0.0  ;;  %v6524_v18 = vmul.f32 %v9376_v40, %v6423_v39  ;;  %v6424_v42 = vadd.f32 %v7880_v37, %v9369_v36 }
 0x25e   : > { %v6574_v43 = vsel %vm6474_vm12, %v6425_v16, %v6526_v17  ;;  %vm6475_vm14 = vcmp.ge.f32.partialorder %v6426_v41, 0.0  ;;  %v6527_v7 = vmul.f32 %v9376_v40, %v6426_v41 }
 0x25f   : > { %6622 = vst [vmem:[%s9385_s10 + $0x50] sm:$0xff] %v6574_v43  ;;  %v6572_v44 = vsel %vm6472_vm13, %v6423_v39, %v6524_v18  ;;  %vm6473_vm15 = vcmp.ge.f32.partialorder %v6424_v42, 0.0  ;;  %v6525_v19 = vmul.f32 %v9376_v40, %v6424_v42  ;;  %v7833_v45 = vpop.f32.mrb[12].mxu0 }
 0x260   : > { %6620 = vst [vmem:[%s9385_s10 + $0x40] sm:$0xff] %v6572_v44  ;;  %v6575_v46 = vsel %vm6475_vm14, %v6426_v41, %v6527_v7  ;;  %v7881_v47 = vadd.f32 %v7833_v45, %v9341_v20  ;;  %v6075_v4 = vpop.f32.mrb[13].mxu0 }
 0x261   : > { %6623 = vst [vmem:[%s9385_s10 + $0x58] sm:$0xff] %v6575_v46  ;;  %v6573_v48 = vsel %vm6473_vm15, %v6424_v42, %v6525_v19  ;;  %v7882_v49 = vadd.f32 %v6075_v4, %v9343_v21  ;;  %v7834_v50 = vpop.f32.mrb[14].mxu0 }
 0x262   : > { %6621 = vst [vmem:[%s9385_s10 + $0x48] sm:$0xff] %v6573_v48  ;;  %v6429_v51 = vadd.f32 %v7881_v47, %v9369_v36  ;;  %v7883_v52 = vadd.f32 %v7834_v50, %v9345_v22  ;;  %v6078_v53 = vpop.f32.mrb[15].mxu0 }
 0x263   : > { %v6427_v54 = vadd.f32 %v7882_v49, %v9369_v36  ;;  %v7884_v55 = vadd.f32 %v6078_v53, %v9347_v23 }
 0x264   : > { %vm6478_vm0 = vcmp.ge.f32.partialorder %v6429_v51, 0.0  ;;  %v6530_v20 = vmul.f32 %v9376_v40, %v6429_v51  ;;  %v6430_v56 = vadd.f32 %v7883_v52, %v9369_v36 }
 0x265   : > { %vm6476_vm1 = vcmp.ge.f32.partialorder %v6427_v54, 0.0  ;;  %v6528_v21 = vmul.f32 %v9376_v40, %v6427_v54  ;;  %v6428_v57 = vadd.f32 %v7884_v55, %v9369_v36 }
 0x266   : > { %v6578_v31 = vsel %vm6478_vm0, %v6429_v51, %v6530_v20  ;;  %vm6479_vm2 = vcmp.ge.f32.partialorder %v6430_v56, 0.0  ;;  %v6531_v22 = vmul.f32 %v9376_v40, %v6430_v56 }
 0x267   : > { %6626 = vst [vmem:[%s9385_s10 + $0x70] sm:$0xff] %v6578_v31  ;;  %v6576_v58 = vsel %vm6476_vm1, %v6427_v54, %v6528_v21  ;;  %vm6477_vm3 = vcmp.ge.f32.partialorder %v6428_v57, 0.0  ;;  %v6529_v23 = vmul.f32 %v9376_v40, %v6428_v57  ;;  %v7837_v59 = vpop.f32.mrb[16].mxu0 }
 0x268   : > { %6624 = vst [vmem:[%s9385_s10 + $0x60] sm:$0xff] %v6576_v58  ;;  %v6579_v30 = vsel %vm6479_vm2, %v6430_v56, %v6531_v22  ;;  %v7885_v60 = vadd.f32 %v7837_v59, %v9349_v24  ;;  %v6091_v61 = vpop.f32.mrb[17].mxu0 }
 0x269   : > { %6627 = vst [vmem:[%s9385_s10 + $0x78] sm:$0xff] %v6579_v30  ;;  %v6577_v28 = vsel %vm6477_vm3, %v6428_v57, %v6529_v23  ;;  %v7886_v62 = vadd.f32 %v6091_v61, %v9351_v25  ;;  %v7838_v63 = vpop.f32.mrb[18].mxu0 }
 0x26a   : > { %6625 = vst [vmem:[%s9385_s10 + $0x68] sm:$0xff] %v6577_v28  ;;  %v6433_v0 = vadd.f32 %v7885_v60, %v9369_v36  ;;  %v7887_v1 = vadd.f32 %v7838_v63, %v9353_v26  ;;  %v6094_v2 = vpop.f32.mrb[19].mxu0 }
 0x26b   : > { %v6431_v3 = vadd.f32 %v7886_v62, %v9369_v36  ;;  %v7888_v5 = vadd.f32 %v6094_v2, %v9355_v27 }
 0x26c   : > { %vm6482_vm4 = vcmp.ge.f32.partialorder %v6433_v0, 0.0  ;;  %v6534_v24 = vmul.f32 %v9376_v40, %v6433_v0  ;;  %v6434_v6 = vadd.f32 %v7887_v1, %v9369_v36 }
 0x26d   : > { %vm6480_vm5 = vcmp.ge.f32.partialorder %v6431_v3, 0.0  ;;  %v6532_v25 = vmul.f32 %v9376_v40, %v6431_v3  ;;  %v6432_v8 = vadd.f32 %v7888_v5, %v9369_v36 }
 0x26e   : > { %v6582_v10 = vsel %vm6482_vm4, %v6433_v0, %v6534_v24  ;;  %vm6483_vm6 = vcmp.ge.f32.partialorder %v6434_v6, 0.0  ;;  %v6535_v26 = vmul.f32 %v9376_v40, %v6434_v6 }
 0x26f   : > { %v7645_v9 = vpop.f32.mrb[24].mxu1  ;;  %6630 = vst [vmem:[%s9385_s10 + $0x90] sm:$0xff] %v6582_v10  ;;  %v6580_v27 = vsel %vm6480_vm5, %v6431_v3, %v6532_v25  ;;  %vm6481_vm7 = vcmp.ge.f32.partialorder %v6432_v8, 0.0  ;;  %v6533_v12 = vmul.f32 %v9376_v40, %v6432_v8  ;;  %v7841_v13 = vpop.f32.mrb[20].mxu0 }
 0x270   : > { %v3361_v11 = vpop.f32.mrb[25].mxu1  ;;  %6628 = vst [vmem:[%s9385_s10 + $0x80] sm:$0xff] %v6580_v27  ;;  %v6583_v15 = vsel %vm6483_vm6, %v6434_v6, %v6535_v26  ;;  %v7889_v16 = vadd.f32 %v7841_v13, %v9357_v29  ;;  %v6107_v35 = vpop.f32.mrb[21].mxu0 }
 0x271   : > { %v7646_v14 = vpop.f32.mrb[26].mxu1  ;;  %6631 = vst [vmem:[%s9385_s10 + $0x98] sm:$0xff] %v6583_v15  ;;  %v6581_v39 = vsel %vm6481_vm7, %v6432_v8, %v6533_v12  ;;  %v7890_v37 = vadd.f32 %v6107_v35, %v9359_v32  ;;  %v7842_v17 = vpop.f32.mrb[22].mxu0 }
 0x272   : > { %v3364_v38 = vpop.f32.mrb[27].mxu1  ;;  %6629 = vst [vmem:[%s9385_s10 + $0x88] sm:$0xff] %v6581_v39  ;;  %v6437_v41 = vadd.f32 %v7889_v16, %v9369_v36  ;;  %v7891_v18 = vadd.f32 %v7842_v17, %v9361_v33  ;;  %v6110_v42 = vpop.f32.mrb[23].mxu0 }
 0x273   : > { %v6435_v43 = vadd.f32 %v7890_v37, %v9369_v36  ;;  %v7892_v7 = vadd.f32 %v6110_v42, %v9363_v34 }
 0x274   : > { %vm6486_vm8 = vcmp.ge.f32.partialorder %v6437_v41, 0.0  ;;  %v6538_v29 = vmul.f32 %v9376_v40, %v6437_v41  ;;  %v6438_v44 = vadd.f32 %v7891_v18, %v9369_v36 }
 0x275   : > { %vm6484_vm9 = vcmp.ge.f32.partialorder %v6435_v43, 0.0  ;;  %v6536_v32 = vmul.f32 %v9376_v40, %v6435_v43  ;;  %v6436_v19 = vadd.f32 %v7892_v7, %v9369_v36 }
 0x276   : > { %v6586_v46 = vsel %vm6486_vm8, %v6437_v41, %v6538_v29  ;;  %vm6487_vm10 = vcmp.ge.f32.partialorder %v6438_v44, 0.0  ;;  %v6539_v33 = vmul.f32 %v9376_v40, %v6438_v44 }
 0x277   : > { %v7649_v45 = vpop.f32.mrb[28].mxu1  ;;  %6634 = vst [vmem:[%s9385_s10 + $0xb0] sm:$0xff] %v6586_v46  ;;  %v6584_v34 = vsel %vm6484_vm9, %v6435_v43, %v6536_v32  ;;  %vm6485_vm11 = vcmp.ge.f32.partialorder %v6436_v19, 0.0  ;;  %v6537_v4 = vmul.f32 %v9376_v40, %v6436_v19  ;;  %v7845_v48 = vpop.f32.mrb[24].mxu0 }
 0x278   : > { %v3377_v47 = vpop.f32.mrb[29].mxu1  ;;  %6632 = vst [vmem:[%s9385_s10 + $0xa0] sm:$0xff] %v6584_v34  ;;  %v6587_v50 = vsel %vm6487_vm10, %v6438_v44, %v6539_v33  ;;  %v7893_v51 = vadd.f32 %v7845_v48, %v7645_v9  ;;  %v6123_v52 = vpop.f32.mrb[25].mxu0 }
 0x279   : > { %v7650_v49 = vpop.f32.mrb[30].mxu1  ;;  %6635 = vst [vmem:[%s9385_s10 + $0xb8] sm:$0xff] %v6587_v50  ;;  %v6585_v54 = vsel %vm6485_vm11, %v6436_v19, %v6537_v4  ;;  %v7894_v55 = vadd.f32 %v6123_v52, %v3361_v11  ;;  %v7846_v20 = vpop.f32.mrb[26].mxu0 }
 0x27a   : > { %v3380_v53 = vpop.f32.mrb[31].mxu1  ;;  %6633 = vst [vmem:[%s9385_s10 + $0xa8] sm:$0xff] %v6585_v54  ;;  %v6441_v56 = vadd.f32 %v7893_v51, %v9369_v36  ;;  %v7895_v21 = vadd.f32 %v7846_v20, %v7646_v14  ;;  %v6126_v57 = vpop.f32.mrb[27].mxu0 }
 0x27b   : > { %v6439_v31 = vadd.f32 %v7894_v55, %v9369_v36  ;;  %v7896_v22 = vadd.f32 %v6126_v57, %v3364_v38 }
 0x27c   : > { %vm6490_vm12 = vcmp.ge.f32.partialorder %v6441_v56, 0.0  ;;  %v6542_v58 = vmul.f32 %v9376_v40, %v6441_v56  ;;  %v6442_v23 = vadd.f32 %v7895_v21, %v9369_v36 }
 0x27d   : > { %vm6488_vm13 = vcmp.ge.f32.partialorder %v6439_v31, 0.0  ;;  %v6540_v59 = vmul.f32 %v9376_v40, %v6439_v31  ;;  %v6440_v30 = vadd.f32 %v7896_v22, %v9369_v36 }
 0x27e   : > { %v6590_v61 = vsel %vm6490_vm12, %v6441_v56, %v6542_v58  ;;  %vm6491_vm14 = vcmp.ge.f32.partialorder %v6442_v23, 0.0  ;;  %v6543_v28 = vmul.f32 %v9376_v40, %v6442_v23 }
 0x27f   : > { %v7653_v60 = vpop.f32.mrb[32].mxu1  ;;  %6638 = vst [vmem:[%s9385_s10 + $0xd0] sm:$0xff] %v6590_v61  ;;  %v6588_v63 = vsel %vm6488_vm13, %v6439_v31, %v6540_v59  ;;  %vm6489_vm15 = vcmp.ge.f32.partialorder %v6440_v30, 0.0  ;;  %v6541_v0 = vmul.f32 %v9376_v40, %v6440_v30  ;;  %v7849_v1 = vpop.f32.mrb[28].mxu0 }
 0x280   : > { %v3393_v62 = vpop.f32.mrb[33].mxu1  ;;  %6636 = vst [vmem:[%s9385_s10 + $0xc0] sm:$0xff] %v6588_v63  ;;  %v6591_v3 = vsel %vm6491_vm14, %v6442_v23, %v6543_v28  ;;  %v7897_v5 = vadd.f32 %v7849_v1, %v7649_v45  ;;  %v6139_v24 = vpop.f32.mrb[29].mxu0 }
 0x281   : > { %v7654_v2 = vpop.f32.mrb[34].mxu1  ;;  %6639 = vst [vmem:[%s9385_s10 + $0xd8] sm:$0xff] %v6591_v3  ;;  %v6589_v25 = vsel %vm6489_vm15, %v6440_v30, %v6541_v0  ;;  %v7898_v8 = vadd.f32 %v6139_v24, %v3377_v47  ;;  %v7850_v9 = vpop.f32.mrb[30].mxu0 }
 0x282   : > { %v3396_v6 = vpop.f32.mrb[35].mxu1  ;;  %6637 = vst [vmem:[%s9385_s10 + $0xc8] sm:$0xff] %v6589_v25  ;;  %v6445_v10 = vadd.f32 %v7897_v5, %v9369_v36  ;;  %v7899_v26 = vadd.f32 %v7850_v9, %v7650_v49  ;;  %v6142_v11 = vpop.f32.mrb[31].mxu0 }
 0x283   : > { %v6443_v27 = vadd.f32 %v7898_v8, %v9369_v36  ;;  %v7900_v12 = vadd.f32 %v6142_v11, %v3380_v53 }
 0x284   : > { %vm6494_vm0 = vcmp.ge.f32.partialorder %v6445_v10, 0.0  ;;  %v6546_v13 = vmul.f32 %v9376_v40, %v6445_v10  ;;  %v6446_v14 = vadd.f32 %v7899_v26, %v9369_v36 }
 0x285   : > { %vm6492_vm1 = vcmp.ge.f32.partialorder %v6443_v27, 0.0  ;;  %v6544_v15 = vmul.f32 %v9376_v40, %v6443_v27  ;;  %v6444_v16 = vadd.f32 %v7900_v12, %v9369_v36 }
 0x286   : > { %v6594_v38 = vsel %vm6494_vm0, %v6445_v10, %v6546_v13  ;;  %vm6495_vm2 = vcmp.ge.f32.partialorder %v6446_v14, 0.0  ;;  %v6547_v39 = vmul.f32 %v9376_v40, %v6446_v14 }
 0x287   : > { %v7657_v35 = vpop.f32.mrb[36].mxu1  ;;  %6642 = vst [vmem:[%s9385_s10 + $0xf0] sm:$0xff] %v6594_v38  ;;  %v6592_v17 = vsel %vm6492_vm1, %v6443_v27, %v6544_v15  ;;  %vm6493_vm3 = vcmp.ge.f32.partialorder %v6444_v16, 0.0  ;;  %v6545_v41 = vmul.f32 %v9376_v40, %v6444_v16  ;;  %v7853_v18 = vpop.f32.mrb[32].mxu0 }
 0x288   : > { %v3409_v37 = vpop.f32.mrb[37].mxu1  ;;  %6640 = vst [vmem:[%s9385_s10 + $0xe0] sm:$0xff] %v6592_v17  ;;  %v6595_v43 = vsel %vm6495_vm2, %v6446_v14, %v6547_v39  ;;  %v7901_v7 = vadd.f32 %v7853_v18, %v7653_v60  ;;  %v6155_v29 = vpop.f32.mrb[33].mxu0 }
 0x289   : > { %v7658_v42 = vpop.f32.mrb[38].mxu1  ;;  %6643 = vst [vmem:[%s9385_s10 + $0xf8] sm:$0xff] %v6595_v43  ;;  %v6593_v32 = vsel %vm6493_vm3, %v6444_v16, %v6545_v41  ;;  %v7902_v19 = vadd.f32 %v6155_v29, %v3393_v62  ;;  %v7854_v45 = vpop.f32.mrb[34].mxu0 }
 0x28a   : > { %v3412_v44 = vpop.f32.mrb[39].mxu1  ;;  %6641 = vst [vmem:[%s9385_s10 + $0xe8] sm:$0xff] %v6593_v32  ;;  %v6449_v46 = vadd.f32 %v7901_v7, %v9369_v36  ;;  %v7903_v33 = vadd.f32 %v7854_v45, %v7654_v2  ;;  %v6158_v47 = vpop.f32.mrb[35].mxu0 }
 0x28b   : > { %v6447_v34 = vadd.f32 %v7902_v19, %v9369_v36  ;;  %v7904_v4 = vadd.f32 %v6158_v47, %v3396_v6 }
 0x28c   : > { %vm6498_vm4 = vcmp.ge.f32.partialorder %v6449_v46, 0.0  ;;  %v6550_v48 = vmul.f32 %v9376_v40, %v6449_v46  ;;  %v6450_v49 = vadd.f32 %v7903_v33, %v9369_v36 }
 0x28d   : > { %vm6496_vm5 = vcmp.ge.f32.partialorder %v6447_v34, 0.0  ;;  %v6548_v50 = vmul.f32 %v9376_v40, %v6447_v34  ;;  %v6448_v51 = vadd.f32 %v7904_v4, %v9369_v36 }
 0x28e   : > { %v6598_v53 = vsel %vm6498_vm4, %v6449_v46, %v6550_v48  ;;  %vm6499_vm6 = vcmp.ge.f32.partialorder %v6450_v49, 0.0  ;;  %v6551_v54 = vmul.f32 %v9376_v40, %v6450_v49 }
 0x28f   : > { %v7661_v52 = vpop.f32.mrb[40].mxu1  ;;  %6646 = vst [vmem:[%s9385_s10 + $0x110] sm:$0xff] %v6598_v53  ;;  %v6596_v20 = vsel %vm6496_vm5, %v6447_v34, %v6548_v50  ;;  %vm6497_vm7 = vcmp.ge.f32.partialorder %v6448_v51, 0.0  ;;  %v6549_v56 = vmul.f32 %v9376_v40, %v6448_v51  ;;  %v7857_v21 = vpop.f32.mrb[36].mxu0 }
 0x290   : > { %v3425_v55 = vpop.f32.mrb[41].mxu1  ;;  %6644 = vst [vmem:[%s9385_s10 + $0x100] sm:$0xff] %v6596_v20  ;;  %v6599_v31 = vsel %vm6499_vm6, %v6450_v49, %v6551_v54  ;;  %v7905_v22 = vadd.f32 %v7857_v21, %v7657_v35  ;;  %v6171_v58 = vpop.f32.mrb[37].mxu0 }
 0x291   : > { %v7662_v57 = vpop.f32.mrb[42].mxu1  ;;  %6647 = vst [vmem:[%s9385_s10 + $0x118] sm:$0xff] %v6599_v31  ;;  %v6597_v59 = vsel %vm6497_vm7, %v6448_v51, %v6549_v56  ;;  %v7906_v30 = vadd.f32 %v6171_v58, %v3409_v37  ;;  %v7858_v60 = vpop.f32.mrb[38].mxu0 }
 0x292   : > { %v3428_v23 = vpop.f32.mrb[43].mxu1  ;;  %6645 = vst [vmem:[%s9385_s10 + $0x108] sm:$0xff] %v6597_v59  ;;  %v6453_v61 = vadd.f32 %v7905_v22, %v9369_v36  ;;  %v7907_v28 = vadd.f32 %v7858_v60, %v7658_v42  ;;  %v6174_v62 = vpop.f32.mrb[39].mxu0 }
 0x293   : > { %v6451_v63 = vadd.f32 %v7906_v30, %v9369_v36  ;;  %v7908_v0 = vadd.f32 %v6174_v62, %v3412_v44 }
 0x294   : > { %vm6502_vm8 = vcmp.ge.f32.partialorder %v6453_v61, 0.0  ;;  %v6554_v1 = vmul.f32 %v9376_v40, %v6453_v61  ;;  %v6454_v2 = vadd.f32 %v7907_v28, %v9369_v36 }
 0x295   : > { %vm6500_vm9 = vcmp.ge.f32.partialorder %v6451_v63, 0.0  ;;  %v6552_v3 = vmul.f32 %v9376_v40, %v6451_v63  ;;  %v6452_v5 = vadd.f32 %v7908_v0, %v9369_v36 }
 0x296   : > { %v6602_v6 = vsel %vm6502_vm8, %v6453_v61, %v6554_v1  ;;  %vm6503_vm10 = vcmp.ge.f32.partialorder %v6454_v2, 0.0  ;;  %v6555_v25 = vmul.f32 %v9376_v40, %v6454_v2 }
 0x297   : > { %v7665_v24 = vpop.f32.mrb[44].mxu1  ;;  %6650 = vst [vmem:[%s9385_s10 + $0x130] sm:$0xff] %v6602_v6  ;;  %v6600_v9 = vsel %vm6500_vm9, %v6451_v63, %v6552_v3  ;;  %vm6501_vm11 = vcmp.ge.f32.partialorder %v6452_v5, 0.0  ;;  %v6553_v10 = vmul.f32 %v9376_v40, %v6452_v5  ;;  %v7861_v26 = vpop.f32.mrb[40].mxu0 }
 0x298   : > { %v3441_v8 = vpop.f32.mrb[45].mxu1  ;;  %6648 = vst [vmem:[%s9385_s10 + $0x120] sm:$0xff] %v6600_v9  ;;  %v6603_v27 = vsel %vm6503_vm10, %v6454_v2, %v6555_v25  ;;  %v7909_v12 = vadd.f32 %v7861_v26, %v7661_v52  ;;  %v6187_v13 = vpop.f32.mrb[41].mxu0 }
 0x299   : > { %v7666_v11 = vpop.f32.mrb[46].mxu1  ;;  %6651 = vst [vmem:[%s9385_s10 + $0x138] sm:$0xff] %v6603_v27  ;;  %v6601_v15 = vsel %vm6501_vm11, %v6452_v5, %v6553_v10  ;;  %v7910_v16 = vadd.f32 %v6187_v13, %v3425_v55  ;;  %v7862_v35 = vpop.f32.mrb[42].mxu0 }
 0x29a   : > { %v3444_v14 = vpop.f32.mrb[47].mxu1  ;;  %6649 = vst [vmem:[%s9385_s10 + $0x128] sm:$0xff] %v6601_v15  ;;  %v6457_v38 = vadd.f32 %v7909_v12, %v9369_v36  ;;  %v7911_v39 = vadd.f32 %v7862_v35, %v7662_v57  ;;  %v6190_v37 = vpop.f32.mrb[43].mxu0 }
 0x29b   : > { %v6455_v17 = vadd.f32 %v7910_v16, %v9369_v36  ;;  %v7912_v41 = vadd.f32 %v6190_v37, %v3428_v23 }
 0x29c   : > { %vm6506_vm12 = vcmp.ge.f32.partialorder %v6457_v38, 0.0  ;;  %v6558_v18 = vmul.f32 %v9376_v40, %v6457_v38  ;;  %v6458_v42 = vadd.f32 %v7911_v39, %v9369_v36 }
 0x29d   : > { %vm6504_vm13 = vcmp.ge.f32.partialorder %v6455_v17, 0.0  ;;  %v6556_v43 = vmul.f32 %v9376_v40, %v6455_v17  ;;  %v6456_v7 = vadd.f32 %v7912_v41, %v9369_v36 }
 0x29e   : > { %v6606_v29 = vsel %vm6506_vm12, %v6457_v38, %v6558_v18  ;;  %vm6507_vm14 = vcmp.ge.f32.partialorder %v6458_v42, 0.0  ;;  %v6559_v44 = vmul.f32 %v9376_v40, %v6458_v42 }
 0x29f   : > { %6654 = vst [vmem:[%s9385_s10 + $0x150] sm:$0xff] %v6606_v29  ;;  %v6604_v32 = vsel %vm6504_vm13, %v6455_v17, %v6556_v43  ;;  %vm6505_vm15 = vcmp.ge.f32.partialorder %v6456_v7, 0.0  ;;  %v6557_v19 = vmul.f32 %v9376_v40, %v6456_v7  ;;  %v7865_v45 = vpop.f32.mrb[44].mxu0 }
 0x2a0   : > { %6652 = vst [vmem:[%s9385_s10 + $0x140] sm:$0xff] %v6604_v32  ;;  %v6607_v46 = vsel %vm6507_vm14, %v6458_v42, %v6559_v44  ;;  %v7913_v33 = vadd.f32 %v7865_v45, %v7665_v24  ;;  %v6203_v47 = vpop.f32.mrb[45].mxu0 }
 0x2a1   : > { %6655 = vst [vmem:[%s9385_s10 + $0x158] sm:$0xff] %v6607_v46  ;;  %v6605_v34 = vsel %vm6505_vm15, %v6456_v7, %v6557_v19  ;;  %v7914_v4 = vadd.f32 %v6203_v47, %v3441_v8  ;;  %v7866_v48 = vpop.f32.mrb[46].mxu0 }
 0x2a2   : > { %6653 = vst [vmem:[%s9385_s10 + $0x148] sm:$0xff] %v6605_v34  ;;  %v6461_v49 = vadd.f32 %v7913_v33, %v9369_v36  ;;  %v7915_v50 = vadd.f32 %v7866_v48, %v7666_v11  ;;  %v6206_v51 = vpop.f32.mrb[47].mxu0 }
 0x2a3   : > { %v6459_v52 = vadd.f32 %v7914_v4, %v9369_v36  ;;  %v7916_v53 = vadd.f32 %v6206_v51, %v3444_v14 }
 0x2a4   : > { %vm6510_vm0 = vcmp.ge.f32.partialorder %v6461_v49, 0.0  ;;  %v6562_v54 = vmul.f32 %v9376_v40, %v6461_v49  ;;  %v6462_v55 = vadd.f32 %v7915_v50, %v9369_v36 }
 0x2a5   : > { %vm6508_vm1 = vcmp.ge.f32.partialorder %v6459_v52, 0.0  ;;  %v6560_v20 = vmul.f32 %v9376_v40, %v6459_v52  ;;  %v6460_v56 = vadd.f32 %v7916_v53, %v9369_v36 }
 0x2a6   : > { %v6610_v21 = vsel %vm6510_vm0, %v6461_v49, %v6562_v54  ;;  %vm6511_vm2 = vcmp.ge.f32.partialorder %v6462_v55, 0.0  ;;  %v6563_v57 = vmul.f32 %v9376_v40, %v6462_v55 }
 0x2a7   : > { %6658 = vst [vmem:[%s9385_s10 + $0x170] sm:$0xff] %v6610_v21  ;;  %v6608_v31 = vsel %vm6508_vm1, %v6459_v52, %v6560_v20  ;;  %vm6509_vm3 = vcmp.ge.f32.partialorder %v6460_v56, 0.0  ;;  %v6561_v22 = vmul.f32 %v9376_v40, %v6460_v56 }
 0x2a8   : > { %6656 = vst [vmem:[%s9385_s10 + $0x160] sm:$0xff] %v6608_v31  ;;  %v6611_v36 = vsel %vm6511_vm2, %v6462_v55, %v6563_v57 }
 0x2a9   : > { %6659 = vst [vmem:[%s9385_s10 + $0x178] sm:$0xff] %v6611_v36  ;;  %v6609_v58 = vsel %vm6509_vm3, %v6460_v56, %v6561_v22 }
 0x2aa   : > { %6657 = vst [vmem:[%s9385_s10 + $0x168] sm:$0xff] %v6609_v58 }
 0x2ab   : > { %8544 = shalt.err (!%p8541_p3)
}
 0x2ac   : > { %s8545_s29 = scalar_lea.hbm %s9542_s20, 6144  ;;  %s8549_s5 = scalar_lea.hbm %s9595_s3, 12288 }
 0x2ad   : > { %p8546_p4 = scmp.ne.s32.totalorder %s9542_s20, %s8545_s29  ;;  %p8550_p9 = scmp.lt.u32.totalorder %s9542_s20, %s9595_s3 }
 0x2ae   : > { %p8551_p10 = scmp.lt.u32.totalorder %s8549_s5, %s8545_s29  ;;  %p8553_p12 = scmp.lt.u32.totalorder %s8545_s29, %s9542_s20 }
 0x2af   : > { %p8547_p7 = pnand %p8546_p4, %p8656_p5 }
 0x2b0   : > { %p8552_p11 = por %p8551_p10, %p8550_p9 }
 0x2b1   : > { %p8548_p8 = pneg %p8547_p7 }
 0x2b2   : > { %p8554_p13 = por %p8553_p12, %p8552_p11 }
 0x2b4   : > { %p8555_p0 = pnand %p8554_p13, %p8548_p8 }
 0x2b6   : > { %8558 = shalt.err (!%p8555_p0)
}
 0x2b7   : > { %s8596_s8 = smov 128   ;;  %s8597_s9 = smov 8  }
 0x2b8   : > { %8266 = dma.vmem_to_hbm [thread:$0]  (%p8656_p5), %s9544_s17, 6144, %s9542_s20, %s9551_s24, %s8596_s8, %s8596_s8, %s8597_s9  }
 0x2b9 PF: > { %p8272_p1 = scmp.ge.s32.totalorder %s8593_s15, 2  ;;  %s6689_s10 = sand.u32 1, %s8581_s12  }
 0x2ba   : > { %s6690_s11 = scalar_lea.sflag [#allocation4], %s6689_s10 }
 0x2bb   : > { %p8269_p2 = pnand %p8272_p1, %p8660_p6 }
 0x2bd   : > { %8576 = dma.done.wait (!%p8269_p2), %s6690_s11, 6144  }
 0x2be   : > { %8578 = vsyncadd (!%p8269_p2), %s6690_s11, 4294961152  ;;  %p13_p3 = scmp.ge.s32.totalorder %s8643_s18, 4   ;;  %s9598_s12 = smov %s8585_s13 }
 0x2bf   : > { %s9599_s13 = smov %s8589_s14  ;;  %s9600_s14 = smov %s8654_s21 }
 0x2c0   : > { %s9601_s15 = smov %s8643_s18  ;;  %15 = sbr.rel (!%p13_p3) target bundleno = 3 (0x3), region = 75 }
 0x2c7   :  { %6695 = vsyncpa [#allocation4], 1 }
 0x2c8   :  { %6697 = vsyncpa [#allocation4 + $0x1], 1 }

</bundles_post_ra>
